<compile_context>
chip_gen: v5e
topology: v5e:2x2
jax: 0.10.0
libtpu: 0.0.40
codegen_flags: <defaults>
</compile_context>

<pallas_src>
import jax
import jax.numpy as jnp
from jax import lax
from jax.experimental import pallas as pl
from jax.experimental.pallas import tpu as pltpu


# -----------------------------------------------------------------------------
# Pallas kernel factory (S, B are static).
# -----------------------------------------------------------------------------
def make_bi_gru_kernel(S, Bp):
    def kernel(x_ref,                                  # (S*Bp, E)
               wihf_ref, whhf_ref, bxf_ref, bhnf_ref,  # fwd: (E,3H),(H,3H),(1,3H),(1,H)
               wihb_ref, whhb_ref, bxb_ref, bhnb_ref,  # bwd: same shapes
               fcw_ref, fcb_ref,                       # (2H, Cp), (1, Cp)
               out_ref,                                 # (Bp, Cp)
               xpf_ref, xpb_ref):                       # scratch: (S*Bp, 3H) each
        H = whhf_ref.shape[0]

        # ---- hoisted input projections: one large MXU matmul per direction ----
        x = x_ref[...]                                                # (S*Bp, E)
        xpf_ref[...] = (jnp.dot(x, wihf_ref[...],
                                preferred_element_type=jnp.float32)
                        + bxf_ref[...])
        xpb_ref[...] = (jnp.dot(x, wihb_ref[...],
                                preferred_element_type=jnp.float32)
                        + bxb_ref[...])

        bhn_f = bhnf_ref[...]                                         # (1, H)
        bhn_b = bhnb_ref[...]

        def gru_update(h, xp, whh_ref, bhn):
            # single fused (Bp,H)x(H,3H) matmul; gate order (r, z, n)
            g = jnp.dot(h, whh_ref[...], preferred_element_type=jnp.float32)
            r = jax.nn.sigmoid(xp[:, 0:H] + g[:, 0:H])
            z = jax.nn.sigmoid(xp[:, H:2 * H] + g[:, H:2 * H])
            n = jnp.tanh(xp[:, 2 * H:3 * H] + r * (g[:, 2 * H:3 * H] + bhn))
            return (1.0 - z) * n + z * h

        h0 = jnp.zeros((Bp, H), jnp.float32)

        # ---- interleaved fwd/bwd recurrence: one serial loop, two chains ----
        def body(t, carry):
            h_f, h_b = carry
            off_f = pl.multiple_of(t * Bp, Bp)
            off_b = pl.multiple_of((S - 1 - t) * Bp, Bp)
            xp_f = xpf_ref[pl.ds(off_f, Bp), :]
            xp_b = xpb_ref[pl.ds(off_b, Bp), :]
            h_f = gru_update(h_f, xp_f, whhf_ref, bhn_f)
            h_b = gru_update(h_b, xp_b, whhb_ref, bhn_b)
            return (h_f, h_b)

        h_f, h_b = lax.fori_loop(0, S, body, (h0, h0), unroll=True)

        # ---- relu + fc without concat: two (H, Cp) slabs of fc_w ----
        hf = jnp.maximum(h_f, 0.0)
        hb = jnp.maximum(h_b, 0.0)
        out_ref[...] = (jnp.dot(hf, fcw_ref[0:H, :],
                                preferred_element_type=jnp.float32)
                        + jnp.dot(hb, fcw_ref[H:2 * H, :],
                                  preferred_element_type=jnp.float32)
                        + fcb_ref[...])

    return kernel


# -----------------------------------------------------------------------------
# Parameter fusion / folding / padding (offline, JAX glue)
# -----------------------------------------------------------------------------
def prepare_params(params, c_pad):
    def fuse(w3):                      # (3, I, H) -> (I, 3H), gate order r|z|n
        return jnp.concatenate([w3[0], w3[1], w3[2]], axis=1)

    def fold_in_bias(bih, bhh):        # -> (1, 3H): [b_ir+b_hr | b_iz+b_hz | b_in]
        return jnp.concatenate(
            [bih[0] + bhh[0], bih[1] + bhh[1], bih[2]], axis=0).reshape(1, -1)

    C = params["fc_b"].shape[-1]
    fc_w = jnp.pad(params["fc_w"], ((0, 0), (0, c_pad - C)))
    fc_b = jnp.pad(params["fc_b"], ((0, 0), (0, c_pad - C)))
    return {
        "wih_f": fuse(params["wih_f"]), "whh_f": fuse(params["whh_f"]),
        "bx_f": fold_in_bias(params["bih_f"], params["bhh_f"]),
        "bhn_f": params["bhh_f"][2].reshape(1, -1),
        "wih_b": fuse(params["wih_b"]), "whh_b": fuse(params["whh_b"]),
        "bx_b": fold_in_bias(params["bih_b"], params["bhh_b"]),
        "bhn_b": params["bhh_b"][2].reshape(1, -1),
        "fc_w": fc_w, "fc_b": fc_b,
    }


# -----------------------------------------------------------------------------
# Wrapper
# -----------------------------------------------------------------------------
def bi_gru_forward(text, params):
    """text: int32 (B, S). Returns (output1, None) like the PyTorch module."""
    B, S = text.shape
    E = params["embedding"].shape[1]
    H = params["whh_f"].shape[-1]
    C = params["fc_b"].shape[-1]

    Bp = ((B + 7) // 8) * 8            # sublane-aligned batch
    Cp = ((C + 127) // 128) * 128      # lane-dense output width

    kp = prepare_params(params, Cp)

    # Time-major gather straight from the embedding table (no separate
    # (B,S,E)->(S,B,E) transpose round-trip); pad batch to Bp sublanes.
    x = params["embedding"][text.T].astype(jnp.float32)          # (S, B, E)
    x = jnp.pad(x, ((0, 0), (0, Bp - B), (0, 0)))                # (S, Bp, E)
    x2d = x.reshape(S * Bp, E)                                   # (S*Bp, E)

    inputs = (x2d,
              kp["wih_f"], kp["whh_f"], kp["bx_f"], kp["bhn_f"],
              kp["wih_b"], kp["whh_b"], kp["bx_b"], kp["bhn_b"],
              kp["fc_w"], kp["fc_b"])

    def spec(arr):
        nd = arr.ndim
        return pl.BlockSpec(arr.shape, lambda i, _nd=nd: (0,) * _nd)

    out = pl.pallas_call(
        make_bi_gru_kernel(S, Bp),
        out_shape=jax.ShapeDtypeStruct((Bp, Cp), jnp.float32),
        grid=(1,),
        in_specs=[spec(a) for a in inputs],
        out_specs=pl.BlockSpec((Bp, Cp), lambda i: (0, 0)),
        scratch_shapes=[pltpu.VMEM((S * Bp, 3 * H), jnp.float32),
                        pltpu.VMEM((S * Bp, 3 * H), jnp.float32)],
        compiler_params=pltpu.CompilerParams(
            dimension_semantics=("arbitrary",),
            vmem_limit_bytes=32 * 1024 * 1024),
    )(*inputs)

    return out[:B, :C], None


# -----------------------------------------------------------------------------
# Pure-JAX reference (PyTorch-equivalent math, per-gate weights)
# -----------------------------------------------------------------------------
def bi_gru_reference(text, params):
    emb = params["embedding"][text].astype(jnp.float32)          # (B, S, E)
    x = jnp.transpose(emb, (1, 0, 2))                            # (S, B, E)

    def gru_dir(x_seq, wih, whh, bih, bhh):
        h0 = jnp.zeros((x_seq.shape[1], whh.shape[-1]), jnp.float32)

        def step(h, x_t):
            r = jax.nn.sigmoid(x_t @ wih[0] + bih[0] + h @ whh[0] + bhh[0])
            z = jax.nn.sigmoid(x_t @ wih[1] + bih[1] + h @ whh[1] + bhh[1])
            n = jnp.tanh(x_t @ wih[2] + bih[2] + r * (h @ whh[2] + bhh[2]))
            return (1.0 - z) * n + z * h, None

        h_last, _ = lax.scan(step, h0, x_seq)
        return h_last

    h_f = gru_dir(x, params["wih_f"], params["whh_f"],
                  params["bih_f"], params["bhh_f"])
    h_b = gru_dir(x[::-1], params["wih_b"], params["whh_b"],
                  params["bih_b"], params["bhh_b"])
    hn = jnp.maximum(jnp.concatenate([h_f, h_b], axis=1), 0.0)
    return hn @ params["fc_w"] + params["fc_b"]


# -----------------------------------------------------------------------------
# Deterministic parameter init (shapes from Bi_GRU.__init__), gate order (r,z,n)
# -----------------------------------------------------------------------------
def init_params(key, voc_len, E, H, C):
    keys = jax.random.split(key, 11)
    s = 1.0 / jnp.sqrt(jnp.float32(H))

    def u(k, shape):
        return jax.random.uniform(k, shape, jnp.float32, -s, s)

    return {
        "embedding": jax.random.normal(keys[0], (voc_len, E), jnp.float32),
        # forward direction, stored pre-transposed for x @ W
        "wih_f": u(keys[1], (3, E, H)),
        "whh_f": u(keys[2], (3, H, H)),
        "bih_f": u(keys[3], (3, H)),
        "bhh_f": u(keys[4], (3, H)),
        # backward direction
        "wih_b": u(keys[5], (3, E, H)),
        "whh_b": u(keys[6], (3, H, H)),
        "bih_b": u(keys[7], (3, H)),
        "bhh_b": u(keys[8], (3, H)),
        # fc_target: Linear(2H, C)
        "fc_w": u(keys[9], (2 * H, C)),
        "fc_b": u(keys[10], (1, C)),
    }


if __name__ == "__main__":
    VOC, E, H, C = 100, 32, 32, 4
    B, S = 2, 8

    key = jax.random.PRNGKey(0)
    k_params, k_text = jax.random.split(key)

    params = init_params(k_params, VOC, E, H, C)
    text = jax.random.randint(k_text, (B, S), 0, VOC, dtype=jnp.int32)

    out1, out2 = bi_gru_forward(text, params)
    out1 = jax.block_until_ready(out1)

    ref = jax.block_until_ready(bi_gru_reference(text, params))

    assert out1.shape == (B, C), out1.shape
    assert out2 is None
    assert jnp.allclose(out1, ref, atol=1e-5, rtol=1e-5), (
        "mismatch vs reference:\n%s\n%s" % (out1, ref))

    print("KERNEL_OK")
</pallas_src>

<mosaic_0001>
module attributes {stable_mosaic.version = 11 : i64} {
  func.func @kernel(%arg0: i32, %arg1: memref<64x32xf32, #tpu.memory_space<vmem>>, %arg2: memref<32x96xf32, #tpu.memory_space<vmem>>, %arg3: memref<32x96xf32, #tpu.memory_space<vmem>>, %arg4: memref<1x96xf32, #tpu.memory_space<vmem>>, %arg5: memref<1x32xf32, #tpu.memory_space<vmem>>, %arg6: memref<32x96xf32, #tpu.memory_space<vmem>>, %arg7: memref<32x96xf32, #tpu.memory_space<vmem>>, %arg8: memref<1x96xf32, #tpu.memory_space<vmem>>, %arg9: memref<1x32xf32, #tpu.memory_space<vmem>>, %arg10: memref<64x128xf32, #tpu.memory_space<vmem>>, %arg11: memref<1x128xf32, #tpu.memory_space<vmem>>, %arg12: memref<8x128xf32, #tpu.memory_space<vmem>>, %arg13: memref<64x96xf32, #tpu.memory_space<vmem>>, %arg14: memref<64x96xf32, #tpu.memory_space<vmem>>) attributes {dimension_semantics = [#tpu.dimension_semantics<arbitrary>], iteration_bounds = array<i64: 1>, scalar_prefetch = 0 : i64, scratch_operands = 2 : i64, tpu.core_type = #tpu.core_type<tc>, window_params = [{pipeline_mode = #tpu.pipeline_mode<synchronous>, transform_indices = @transform_0, window_bounds = array<i64: 64, 32>}, {pipeline_mode = #tpu.pipeline_mode<synchronous>, transform_indices = @transform_1, window_bounds = array<i64: 32, 96>}, {pipeline_mode = #tpu.pipeline_mode<synchronous>, transform_indices = @transform_2, window_bounds = array<i64: 32, 96>}, {pipeline_mode = #tpu.pipeline_mode<synchronous>, transform_indices = @transform_3, window_bounds = array<i64: 1, 96>}, {pipeline_mode = #tpu.pipeline_mode<synchronous>, transform_indices = @transform_4, window_bounds = array<i64: 1, 32>}, {pipeline_mode = #tpu.pipeline_mode<synchronous>, transform_indices = @transform_5, window_bounds = array<i64: 32, 96>}, {pipeline_mode = #tpu.pipeline_mode<synchronous>, transform_indices = @transform_6, window_bounds = array<i64: 32, 96>}, {pipeline_mode = #tpu.pipeline_mode<synchronous>, transform_indices = @transform_7, window_bounds = array<i64: 1, 96>}, {pipeline_mode = #tpu.pipeline_mode<synchronous>, transform_indices = @transform_8, window_bounds = array<i64: 1, 32>}, {pipeline_mode = #tpu.pipeline_mode<synchronous>, transform_indices = @transform_9, window_bounds = array<i64: 64, 128>}, {pipeline_mode = #tpu.pipeline_mode<synchronous>, transform_indices = @transform_10, window_bounds = array<i64: 1, 128>}, {pipeline_mode = #tpu.pipeline_mode<synchronous>, transform_indices = @transform_11, window_bounds = array<i64: 8, 128>}]} {
    %c0 = arith.constant 0 : index
    %c0_0 = arith.constant 0 : index
    %0 = vector.load %arg1[%c0, %c0_0] : memref<64x32xf32, #tpu.memory_space<vmem>>, vector<64x32xf32>
    %c0_1 = arith.constant 0 : index
    %c0_2 = arith.constant 0 : index
    %1 = vector.load %arg2[%c0_1, %c0_2] : memref<32x96xf32, #tpu.memory_space<vmem>>, vector<32x96xf32>
    %cst = arith.constant dense<0.000000e+00> : vector<64x96xf32>
    %2 = tpu.matmul %0, %1, %cst {dimension_numbers = #tpu.dot_dimension_numbers<[1], [0], [0], [1], [0, 0, 1, 1], [], []>} : vector<64x32xf32>, vector<32x96xf32>, vector<64x96xf32> -> vector<64x96xf32>
    %c0_3 = arith.constant 0 : index
    %c0_4 = arith.constant 0 : index
    %3 = vector.load %arg4[%c0_3, %c0_4] : memref<1x96xf32, #tpu.memory_space<vmem>>, vector<1x96xf32>
    %4 = vector.broadcast %3 : vector<1x96xf32> to vector<64x96xf32>
    %5 = arith.addf %2, %4 : vector<64x96xf32>
    %c0_5 = arith.constant 0 : index
    %c0_6 = arith.constant 0 : index
    %6 = vector.load %arg13[%c0_5, %c0_6] : memref<64x96xf32, #tpu.memory_space<vmem>>, vector<64x96xf32>
    tpu.vector_store %arg13[%c0_5, %c0_6], %5 {strides = array<i32>} : memref<64x96xf32, #tpu.memory_space<vmem>>, vector<64x96xf32>,
    %c0_7 = arith.constant 0 : index
    %c0_8 = arith.constant 0 : index
    %7 = vector.load %arg6[%c0_7, %c0_8] : memref<32x96xf32, #tpu.memory_space<vmem>>, vector<32x96xf32>
    %cst_9 = arith.constant dense<0.000000e+00> : vector<64x96xf32>
    %8 = tpu.matmul %0, %7, %cst_9 {dimension_numbers = #tpu.dot_dimension_numbers<[1], [0], [0], [1], [0, 0, 1, 1], [], []>} : vector<64x32xf32>, vector<32x96xf32>, vector<64x96xf32> -> vector<64x96xf32>
    %c0_10 = arith.constant 0 : index
    %c0_11 = arith.constant 0 : index
    %9 = vector.load %arg8[%c0_10, %c0_11] : memref<1x96xf32, #tpu.memory_space<vmem>>, vector<1x96xf32>
    %10 = vector.broadcast %9 : vector<1x96xf32> to vector<64x96xf32>
    %11 = arith.addf %8, %10 : vector<64x96xf32>
    %c0_12 = arith.constant 0 : index
    %c0_13 = arith.constant 0 : index
    %12 = vector.load %arg14[%c0_12, %c0_13] : memref<64x96xf32, #tpu.memory_space<vmem>>, vector<64x96xf32>
    tpu.vector_store %arg14[%c0_12, %c0_13], %11 {strides = array<i32>} : memref<64x96xf32, #tpu.memory_space<vmem>>, vector<64x96xf32>,
    %c0_14 = arith.constant 0 : index
    %c0_15 = arith.constant 0 : index
    %13 = vector.load %arg5[%c0_14, %c0_15] : memref<1x32xf32, #tpu.memory_space<vmem>>, vector<1x32xf32>
    %c0_16 = arith.constant 0 : index
    %c0_17 = arith.constant 0 : index
    %14 = vector.load %arg9[%c0_16, %c0_17] : memref<1x32xf32, #tpu.memory_space<vmem>>, vector<1x32xf32>
    %cst_18 = arith.constant 0.000000e+00 : f32
    %15 = vector.broadcast %cst_18 : f32 to vector<8x32xf32>
    %c0_i32 = arith.constant 0 : i32
    %c8_i32 = arith.constant 8 : i32
    %16 = arith.muli %c0_i32, %c8_i32 : i32
    %17 = tpu.assume_multiple %16, 8 : i32
    %c7_i32 = arith.constant 7 : i32
    %18 = arith.subi %c7_i32, %c0_i32 : i32
    %c8_i32_19 = arith.constant 8 : i32
    %19 = arith.muli %18, %c8_i32_19 : i32
    %20 = tpu.assume_multiple %19, 8 : i32
    %21 = arith.index_cast %17 : i32 to index
    %c0_20 = arith.constant 0 : index
    %22 = vector.load %arg13[%21, %c0_20] : memref<64x96xf32, #tpu.memory_space<vmem>>, vector<8x96xf32>
    %23 = arith.index_cast %20 : i32 to index
    %c0_21 = arith.constant 0 : index
    %24 = vector.load %arg14[%23, %c0_21] : memref<64x96xf32, #tpu.memory_space<vmem>>, vector<8x96xf32>
    %c0_22 = arith.constant 0 : index
    %c0_23 = arith.constant 0 : index
    %25 = vector.load %arg3[%c0_22, %c0_23] : memref<32x96xf32, #tpu.memory_space<vmem>>, vector<32x96xf32>
    %cst_24 = arith.constant dense<0.000000e+00> : vector<8x96xf32>
    %26 = tpu.matmul %15, %25, %cst_24 {dimension_numbers = #tpu.dot_dimension_numbers<[1], [0], [0], [1], [0, 0, 1, 1], [], []>} : vector<8x32xf32>, vector<32x96xf32>, vector<8x96xf32> -> vector<8x96xf32>
    %27 = vector.extract_strided_slice %22 {offsets = [0, 0], sizes = [8, 32], strides = [1, 1]} : vector<8x96xf32> to vector<8x32xf32>
    %28 = vector.extract_strided_slice %26 {offsets = [0, 0], sizes = [8, 32], strides = [1, 1]} : vector<8x96xf32> to vector<8x32xf32>
    %29 = arith.addf %27, %28 : vector<8x32xf32>
    %30 = arith.negf %29 : vector<8x32xf32>
    %31 = math.exp %30 : vector<8x32xf32>
    %cst_25 = arith.constant 1.000000e+00 : f32
    %32 = vector.broadcast %cst_25 : f32 to vector<8x32xf32>
    %33 = arith.addf %32, %31 : vector<8x32xf32>
    %34 = arith.divf %32, %33 : vector<8x32xf32>
    %35 = vector.extract_strided_slice %22 {offsets = [0, 32], sizes = [8, 32], strides = [1, 1]} : vector<8x96xf32> to vector<8x32xf32>
    %36 = vector.extract_strided_slice %26 {offsets = [0, 32], sizes = [8, 32], strides = [1, 1]} : vector<8x96xf32> to vector<8x32xf32>
    %37 = arith.addf %35, %36 : vector<8x32xf32>
    %38 = arith.negf %37 : vector<8x32xf32>
    %39 = math.exp %38 : vector<8x32xf32>
    %cst_26 = arith.constant 1.000000e+00 : f32
    %40 = vector.broadcast %cst_26 : f32 to vector<8x32xf32>
    %41 = arith.addf %40, %39 : vector<8x32xf32>
    %42 = arith.divf %40, %41 : vector<8x32xf32>
    %43 = vector.extract_strided_slice %22 {offsets = [0, 64], sizes = [8, 32], strides = [1, 1]} : vector<8x96xf32> to vector<8x32xf32>
    %44 = vector.extract_strided_slice %26 {offsets = [0, 64], sizes = [8, 32], strides = [1, 1]} : vector<8x96xf32> to vector<8x32xf32>
    %45 = vector.broadcast %13 : vector<1x32xf32> to vector<8x32xf32>
    %46 = arith.addf %44, %45 : vector<8x32xf32>
    %47 = arith.mulf %34, %46 : vector<8x32xf32>
    %48 = arith.addf %43, %47 : vector<8x32xf32>
    %49 = math.tanh %48 : vector<8x32xf32>
    %cst_27 = arith.constant 1.000000e+00 : f32
    %50 = vector.broadcast %cst_27 : f32 to vector<8x32xf32>
    %51 = arith.subf %50, %42 : vector<8x32xf32>
    %52 = arith.mulf %51, %49 : vector<8x32xf32>
    %53 = arith.mulf %42, %15 : vector<8x32xf32>
    %54 = arith.addf %52, %53 : vector<8x32xf32>
    %c0_28 = arith.constant 0 : index
    %c0_29 = arith.constant 0 : index
    %55 = vector.load %arg7[%c0_28, %c0_29] : memref<32x96xf32, #tpu.memory_space<vmem>>, vector<32x96xf32>
    %cst_30 = arith.constant dense<0.000000e+00> : vector<8x96xf32>
    %56 = tpu.matmul %15, %55, %cst_30 {dimension_numbers = #tpu.dot_dimension_numbers<[1], [0], [0], [1], [0, 0, 1, 1], [], []>} : vector<8x32xf32>, vector<32x96xf32>, vector<8x96xf32> -> vector<8x96xf32>
    %57 = vector.extract_strided_slice %24 {offsets = [0, 0], sizes = [8, 32], strides = [1, 1]} : vector<8x96xf32> to vector<8x32xf32>
    %58 = vector.extract_strided_slice %56 {offsets = [0, 0], sizes = [8, 32], strides = [1, 1]} : vector<8x96xf32> to vector<8x32xf32>
    %59 = arith.addf %57, %58 : vector<8x32xf32>
    %60 = arith.negf %59 : vector<8x32xf32>
    %61 = math.exp %60 : vector<8x32xf32>
    %cst_31 = arith.constant 1.000000e+00 : f32
    %62 = vector.broadcast %cst_31 : f32 to vector<8x32xf32>
    %63 = arith.addf %62, %61 : vector<8x32xf32>
    %64 = arith.divf %62, %63 : vector<8x32xf32>
    %65 = vector.extract_strided_slice %24 {offsets = [0, 32], sizes = [8, 32], strides = [1, 1]} : vector<8x96xf32> to vector<8x32xf32>
    %66 = vector.extract_strided_slice %56 {offsets = [0, 32], sizes = [8, 32], strides = [1, 1]} : vector<8x96xf32> to vector<8x32xf32>
    %67 = arith.addf %65, %66 : vector<8x32xf32>
    %68 = arith.negf %67 : vector<8x32xf32>
    %69 = math.exp %68 : vector<8x32xf32>
    %cst_32 = arith.constant 1.000000e+00 : f32
    %70 = vector.broadcast %cst_32 : f32 to vector<8x32xf32>
    %71 = arith.addf %70, %69 : vector<8x32xf32>
    %72 = arith.divf %70, %71 : vector<8x32xf32>
    %73 = vector.extract_strided_slice %24 {offsets = [0, 64], sizes = [8, 32], strides = [1, 1]} : vector<8x96xf32> to vector<8x32xf32>
    %74 = vector.extract_strided_slice %56 {offsets = [0, 64], sizes = [8, 32], strides = [1, 1]} : vector<8x96xf32> to vector<8x32xf32>
    %75 = vector.broadcast %14 : vector<1x32xf32> to vector<8x32xf32>
    %76 = arith.addf %74, %75 : vector<8x32xf32>
    %77 = arith.mulf %64, %76 : vector<8x32xf32>
    %78 = arith.addf %73, %77 : vector<8x32xf32>
    %79 = math.tanh %78 : vector<8x32xf32>
    %cst_33 = arith.constant 1.000000e+00 : f32
    %80 = vector.broadcast %cst_33 : f32 to vector<8x32xf32>
    %81 = arith.subf %80, %72 : vector<8x32xf32>
    %82 = arith.mulf %81, %79 : vector<8x32xf32>
    %83 = arith.mulf %72, %15 : vector<8x32xf32>
    %84 = arith.addf %82, %83 : vector<8x32xf32>
    %c1_i32 = arith.constant 1 : i32
    %c8_i32_34 = arith.constant 8 : i32
    %85 = arith.muli %c1_i32, %c8_i32_34 : i32
    %86 = tpu.assume_multiple %85, 8 : i32
    %c7_i32_35 = arith.constant 7 : i32
    %87 = arith.subi %c7_i32_35, %c1_i32 : i32
    %c8_i32_36 = arith.constant 8 : i32
    %88 = arith.muli %87, %c8_i32_36 : i32
    %89 = tpu.assume_multiple %88, 8 : i32
    %90 = arith.index_cast %86 : i32 to index
    %c0_37 = arith.constant 0 : index
    %91 = vector.load %arg13[%90, %c0_37] : memref<64x96xf32, #tpu.memory_space<vmem>>, vector<8x96xf32>
    %92 = arith.index_cast %89 : i32 to index
    %c0_38 = arith.constant 0 : index
    %93 = vector.load %arg14[%92, %c0_38] : memref<64x96xf32, #tpu.memory_space<vmem>>, vector<8x96xf32>
    %c0_39 = arith.constant 0 : index
    %c0_40 = arith.constant 0 : index
    %94 = vector.load %arg3[%c0_39, %c0_40] : memref<32x96xf32, #tpu.memory_space<vmem>>, vector<32x96xf32>
    %cst_41 = arith.constant dense<0.000000e+00> : vector<8x96xf32>
    %95 = tpu.matmul %54, %94, %cst_41 {dimension_numbers = #tpu.dot_dimension_numbers<[1], [0], [0], [1], [0, 0, 1, 1], [], []>} : vector<8x32xf32>, vector<32x96xf32>, vector<8x96xf32> -> vector<8x96xf32>
    %96 = vector.extract_strided_slice %91 {offsets = [0, 0], sizes = [8, 32], strides = [1, 1]} : vector<8x96xf32> to vector<8x32xf32>
    %97 = vector.extract_strided_slice %95 {offsets = [0, 0], sizes = [8, 32], strides = [1, 1]} : vector<8x96xf32> to vector<8x32xf32>
    %98 = arith.addf %96, %97 : vector<8x32xf32>
    %99 = arith.negf %98 : vector<8x32xf32>
    %100 = math.exp %99 : vector<8x32xf32>
    %cst_42 = arith.constant 1.000000e+00 : f32
    %101 = vector.broadcast %cst_42 : f32 to vector<8x32xf32>
    %102 = arith.addf %101, %100 : vector<8x32xf32>
    %103 = arith.divf %101, %102 : vector<8x32xf32>
    %104 = vector.extract_strided_slice %91 {offsets = [0, 32], sizes = [8, 32], strides = [1, 1]} : vector<8x96xf32> to vector<8x32xf32>
    %105 = vector.extract_strided_slice %95 {offsets = [0, 32], sizes = [8, 32], strides = [1, 1]} : vector<8x96xf32> to vector<8x32xf32>
    %106 = arith.addf %104, %105 : vector<8x32xf32>
    %107 = arith.negf %106 : vector<8x32xf32>
    %108 = math.exp %107 : vector<8x32xf32>
    %cst_43 = arith.constant 1.000000e+00 : f32
    %109 = vector.broadcast %cst_43 : f32 to vector<8x32xf32>
    %110 = arith.addf %109, %108 : vector<8x32xf32>
    %111 = arith.divf %109, %110 : vector<8x32xf32>
    %112 = vector.extract_strided_slice %91 {offsets = [0, 64], sizes = [8, 32], strides = [1, 1]} : vector<8x96xf32> to vector<8x32xf32>
    %113 = vector.extract_strided_slice %95 {offsets = [0, 64], sizes = [8, 32], strides = [1, 1]} : vector<8x96xf32> to vector<8x32xf32>
    %114 = vector.broadcast %13 : vector<1x32xf32> to vector<8x32xf32>
    %115 = arith.addf %113, %114 : vector<8x32xf32>
    %116 = arith.mulf %103, %115 : vector<8x32xf32>
    %117 = arith.addf %112, %116 : vector<8x32xf32>
    %118 = math.tanh %117 : vector<8x32xf32>
    %cst_44 = arith.constant 1.000000e+00 : f32
    %119 = vector.broadcast %cst_44 : f32 to vector<8x32xf32>
    %120 = arith.subf %119, %111 : vector<8x32xf32>
    %121 = arith.mulf %120, %118 : vector<8x32xf32>
    %122 = arith.mulf %111, %54 : vector<8x32xf32>
    %123 = arith.addf %121, %122 : vector<8x32xf32>
    %c0_45 = arith.constant 0 : index
    %c0_46 = arith.constant 0 : index
    %124 = vector.load %arg7[%c0_45, %c0_46] : memref<32x96xf32, #tpu.memory_space<vmem>>, vector<32x96xf32>
    %cst_47 = arith.constant dense<0.000000e+00> : vector<8x96xf32>
    %125 = tpu.matmul %84, %124, %cst_47 {dimension_numbers = #tpu.dot_dimension_numbers<[1], [0], [0], [1], [0, 0, 1, 1], [], []>} : vector<8x32xf32>, vector<32x96xf32>, vector<8x96xf32> -> vector<8x96xf32>
    %126 = vector.extract_strided_slice %93 {offsets = [0, 0], sizes = [8, 32], strides = [1, 1]} : vector<8x96xf32> to vector<8x32xf32>
    %127 = vector.extract_strided_slice %125 {offsets = [0, 0], sizes = [8, 32], strides = [1, 1]} : vector<8x96xf32> to vector<8x32xf32>
    %128 = arith.addf %126, %127 : vector<8x32xf32>
    %129 = arith.negf %128 : vector<8x32xf32>
    %130 = math.exp %129 : vector<8x32xf32>
    %cst_48 = arith.constant 1.000000e+00 : f32
    %131 = vector.broadcast %cst_48 : f32 to vector<8x32xf32>
    %132 = arith.addf %131, %130 : vector<8x32xf32>
    %133 = arith.divf %131, %132 : vector<8x32xf32>
    %134 = vector.extract_strided_slice %93 {offsets = [0, 32], sizes = [8, 32], strides = [1, 1]} : vector<8x96xf32> to vector<8x32xf32>
    %135 = vector.extract_strided_slice %125 {offsets = [0, 32], sizes = [8, 32], strides = [1, 1]} : vector<8x96xf32> to vector<8x32xf32>
    %136 = arith.addf %134, %135 : vector<8x32xf32>
    %137 = arith.negf %136 : vector<8x32xf32>
    %138 = math.exp %137 : vector<8x32xf32>
    %cst_49 = arith.constant 1.000000e+00 : f32
    %139 = vector.broadcast %cst_49 : f32 to vector<8x32xf32>
    %140 = arith.addf %139, %138 : vector<8x32xf32>
    %141 = arith.divf %139, %140 : vector<8x32xf32>
    %142 = vector.extract_strided_slice %93 {offsets = [0, 64], sizes = [8, 32], strides = [1, 1]} : vector<8x96xf32> to vector<8x32xf32>
    %143 = vector.extract_strided_slice %125 {offsets = [0, 64], sizes = [8, 32], strides = [1, 1]} : vector<8x96xf32> to vector<8x32xf32>
    %144 = vector.broadcast %14 : vector<1x32xf32> to vector<8x32xf32>
    %145 = arith.addf %143, %144 : vector<8x32xf32>
    %146 = arith.mulf %133, %145 : vector<8x32xf32>
    %147 = arith.addf %142, %146 : vector<8x32xf32>
    %148 = math.tanh %147 : vector<8x32xf32>
    %cst_50 = arith.constant 1.000000e+00 : f32
    %149 = vector.broadcast %cst_50 : f32 to vector<8x32xf32>
    %150 = arith.subf %149, %141 : vector<8x32xf32>
    %151 = arith.mulf %150, %148 : vector<8x32xf32>
    %152 = arith.mulf %141, %84 : vector<8x32xf32>
    %153 = arith.addf %151, %152 : vector<8x32xf32>
    %c2_i32 = arith.constant 2 : i32
    %c8_i32_51 = arith.constant 8 : i32
    %154 = arith.muli %c2_i32, %c8_i32_51 : i32
    %155 = tpu.assume_multiple %154, 8 : i32
    %c7_i32_52 = arith.constant 7 : i32
    %156 = arith.subi %c7_i32_52, %c2_i32 : i32
    %c8_i32_53 = arith.constant 8 : i32
    %157 = arith.muli %156, %c8_i32_53 : i32
    %158 = tpu.assume_multiple %157, 8 : i32
    %159 = arith.index_cast %155 : i32 to index
    %c0_54 = arith.constant 0 : index
    %160 = vector.load %arg13[%159, %c0_54] : memref<64x96xf32, #tpu.memory_space<vmem>>, vector<8x96xf32>
    %161 = arith.index_cast %158 : i32 to index
    %c0_55 = arith.constant 0 : index
    %162 = vector.load %arg14[%161, %c0_55] : memref<64x96xf32, #tpu.memory_space<vmem>>, vector<8x96xf32>
    %c0_56 = arith.constant 0 : index
    %c0_57 = arith.constant 0 : index
    %163 = vector.load %arg3[%c0_56, %c0_57] : memref<32x96xf32, #tpu.memory_space<vmem>>, vector<32x96xf32>
    %cst_58 = arith.constant dense<0.000000e+00> : vector<8x96xf32>
    %164 = tpu.matmul %123, %163, %cst_58 {dimension_numbers = #tpu.dot_dimension_numbers<[1], [0], [0], [1], [0, 0, 1, 1], [], []>} : vector<8x32xf32>, vector<32x96xf32>, vector<8x96xf32> -> vector<8x96xf32>
    %165 = vector.extract_strided_slice %160 {offsets = [0, 0], sizes = [8, 32], strides = [1, 1]} : vector<8x96xf32> to vector<8x32xf32>
    %166 = vector.extract_strided_slice %164 {offsets = [0, 0], sizes = [8, 32], strides = [1, 1]} : vector<8x96xf32> to vector<8x32xf32>
    %167 = arith.addf %165, %166 : vector<8x32xf32>
    %168 = arith.negf %167 : vector<8x32xf32>
    %169 = math.exp %168 : vector<8x32xf32>
    %cst_59 = arith.constant 1.000000e+00 : f32
    %170 = vector.broadcast %cst_59 : f32 to vector<8x32xf32>
    %171 = arith.addf %170, %169 : vector<8x32xf32>
    %172 = arith.divf %170, %171 : vector<8x32xf32>
    %173 = vector.extract_strided_slice %160 {offsets = [0, 32], sizes = [8, 32], strides = [1, 1]} : vector<8x96xf32> to vector<8x32xf32>
    %174 = vector.extract_strided_slice %164 {offsets = [0, 32], sizes = [8, 32], strides = [1, 1]} : vector<8x96xf32> to vector<8x32xf32>
    %175 = arith.addf %173, %174 : vector<8x32xf32>
    %176 = arith.negf %175 : vector<8x32xf32>
    %177 = math.exp %176 : vector<8x32xf32>
    %cst_60 = arith.constant 1.000000e+00 : f32
    %178 = vector.broadcast %cst_60 : f32 to vector<8x32xf32>
    %179 = arith.addf %178, %177 : vector<8x32xf32>
    %180 = arith.divf %178, %179 : vector<8x32xf32>
    %181 = vector.extract_strided_slice %160 {offsets = [0, 64], sizes = [8, 32], strides = [1, 1]} : vector<8x96xf32> to vector<8x32xf32>
    %182 = vector.extract_strided_slice %164 {offsets = [0, 64], sizes = [8, 32], strides = [1, 1]} : vector<8x96xf32> to vector<8x32xf32>
    %183 = vector.broadcast %13 : vector<1x32xf32> to vector<8x32xf32>
    %184 = arith.addf %182, %183 : vector<8x32xf32>
    %185 = arith.mulf %172, %184 : vector<8x32xf32>
    %186 = arith.addf %181, %185 : vector<8x32xf32>
    %187 = math.tanh %186 : vector<8x32xf32>
    %cst_61 = arith.constant 1.000000e+00 : f32
    %188 = vector.broadcast %cst_61 : f32 to vector<8x32xf32>
    %189 = arith.subf %188, %180 : vector<8x32xf32>
    %190 = arith.mulf %189, %187 : vector<8x32xf32>
    %191 = arith.mulf %180, %123 : vector<8x32xf32>
    %192 = arith.addf %190, %191 : vector<8x32xf32>
    %c0_62 = arith.constant 0 : index
    %c0_63 = arith.constant 0 : index
    %193 = vector.load %arg7[%c0_62, %c0_63] : memref<32x96xf32, #tpu.memory_space<vmem>>, vector<32x96xf32>
    %cst_64 = arith.constant dense<0.000000e+00> : vector<8x96xf32>
    %194 = tpu.matmul %153, %193, %cst_64 {dimension_numbers = #tpu.dot_dimension_numbers<[1], [0], [0], [1], [0, 0, 1, 1], [], []>} : vector<8x32xf32>, vector<32x96xf32>, vector<8x96xf32> -> vector<8x96xf32>
    %195 = vector.extract_strided_slice %162 {offsets = [0, 0], sizes = [8, 32], strides = [1, 1]} : vector<8x96xf32> to vector<8x32xf32>
    %196 = vector.extract_strided_slice %194 {offsets = [0, 0], sizes = [8, 32], strides = [1, 1]} : vector<8x96xf32> to vector<8x32xf32>
    %197 = arith.addf %195, %196 : vector<8x32xf32>
    %198 = arith.negf %197 : vector<8x32xf32>
    %199 = math.exp %198 : vector<8x32xf32>
    %cst_65 = arith.constant 1.000000e+00 : f32
    %200 = vector.broadcast %cst_65 : f32 to vector<8x32xf32>
    %201 = arith.addf %200, %199 : vector<8x32xf32>
    %202 = arith.divf %200, %201 : vector<8x32xf32>
    %203 = vector.extract_strided_slice %162 {offsets = [0, 32], sizes = [8, 32], strides = [1, 1]} : vector<8x96xf32> to vector<8x32xf32>
    %204 = vector.extract_strided_slice %194 {offsets = [0, 32], sizes = [8, 32], strides = [1, 1]} : vector<8x96xf32> to vector<8x32xf32>
    %205 = arith.addf %203, %204 : vector<8x32xf32>
    %206 = arith.negf %205 : vector<8x32xf32>
    %207 = math.exp %206 : vector<8x32xf32>
    %cst_66 = arith.constant 1.000000e+00 : f32
    %208 = vector.broadcast %cst_66 : f32 to vector<8x32xf32>
    %209 = arith.addf %208, %207 : vector<8x32xf32>
    %210 = arith.divf %208, %209 : vector<8x32xf32>
    %211 = vector.extract_strided_slice %162 {offsets = [0, 64], sizes = [8, 32], strides = [1, 1]} : vector<8x96xf32> to vector<8x32xf32>
    %212 = vector.extract_strided_slice %194 {offsets = [0, 64], sizes = [8, 32], strides = [1, 1]} : vector<8x96xf32> to vector<8x32xf32>
    %213 = vector.broadcast %14 : vector<1x32xf32> to vector<8x32xf32>
    %214 = arith.addf %212, %213 : vector<8x32xf32>
    %215 = arith.mulf %202, %214 : vector<8x32xf32>
    %216 = arith.addf %211, %215 : vector<8x32xf32>
    %217 = math.tanh %216 : vector<8x32xf32>
    %cst_67 = arith.constant 1.000000e+00 : f32
    %218 = vector.broadcast %cst_67 : f32 to vector<8x32xf32>
    %219 = arith.subf %218, %210 : vector<8x32xf32>
    %220 = arith.mulf %219, %217 : vector<8x32xf32>
    %221 = arith.mulf %210, %153 : vector<8x32xf32>
    %222 = arith.addf %220, %221 : vector<8x32xf32>
    %c3_i32 = arith.constant 3 : i32
    %c8_i32_68 = arith.constant 8 : i32
    %223 = arith.muli %c3_i32, %c8_i32_68 : i32
    %224 = tpu.assume_multiple %223, 8 : i32
    %c7_i32_69 = arith.constant 7 : i32
    %225 = arith.subi %c7_i32_69, %c3_i32 : i32
    %c8_i32_70 = arith.constant 8 : i32
    %226 = arith.muli %225, %c8_i32_70 : i32
    %227 = tpu.assume_multiple %226, 8 : i32
    %228 = arith.index_cast %224 : i32 to index
    %c0_71 = arith.constant 0 : index
    %229 = vector.load %arg13[%228, %c0_71] : memref<64x96xf32, #tpu.memory_space<vmem>>, vector<8x96xf32>
    %230 = arith.index_cast %227 : i32 to index
    %c0_72 = arith.constant 0 : index
    %231 = vector.load %arg14[%230, %c0_72] : memref<64x96xf32, #tpu.memory_space<vmem>>, vector<8x96xf32>
    %c0_73 = arith.constant 0 : index
    %c0_74 = arith.constant 0 : index
    %232 = vector.load %arg3[%c0_73, %c0_74] : memref<32x96xf32, #tpu.memory_space<vmem>>, vector<32x96xf32>
    %cst_75 = arith.constant dense<0.000000e+00> : vector<8x96xf32>
    %233 = tpu.matmul %192, %232, %cst_75 {dimension_numbers = #tpu.dot_dimension_numbers<[1], [0], [0], [1], [0, 0, 1, 1], [], []>} : vector<8x32xf32>, vector<32x96xf32>, vector<8x96xf32> -> vector<8x96xf32>
    %234 = vector.extract_strided_slice %229 {offsets = [0, 0], sizes = [8, 32], strides = [1, 1]} : vector<8x96xf32> to vector<8x32xf32>
    %235 = vector.extract_strided_slice %233 {offsets = [0, 0], sizes = [8, 32], strides = [1, 1]} : vector<8x96xf32> to vector<8x32xf32>
    %236 = arith.addf %234, %235 : vector<8x32xf32>
    %237 = arith.negf %236 : vector<8x32xf32>
    %238 = math.exp %237 : vector<8x32xf32>
    %cst_76 = arith.constant 1.000000e+00 : f32
    %239 = vector.broadcast %cst_76 : f32 to vector<8x32xf32>
    %240 = arith.addf %239, %238 : vector<8x32xf32>
    %241 = arith.divf %239, %240 : vector<8x32xf32>
    %242 = vector.extract_strided_slice %229 {offsets = [0, 32], sizes = [8, 32], strides = [1, 1]} : vector<8x96xf32> to vector<8x32xf32>
    %243 = vector.extract_strided_slice %233 {offsets = [0, 32], sizes = [8, 32], strides = [1, 1]} : vector<8x96xf32> to vector<8x32xf32>
    %244 = arith.addf %242, %243 : vector<8x32xf32>
    %245 = arith.negf %244 : vector<8x32xf32>
    %246 = math.exp %245 : vector<8x32xf32>
    %cst_77 = arith.constant 1.000000e+00 : f32
    %247 = vector.broadcast %cst_77 : f32 to vector<8x32xf32>
    %248 = arith.addf %247, %246 : vector<8x32xf32>
    %249 = arith.divf %247, %248 : vector<8x32xf32>
    %250 = vector.extract_strided_slice %229 {offsets = [0, 64], sizes = [8, 32], strides = [1, 1]} : vector<8x96xf32> to vector<8x32xf32>
    %251 = vector.extract_strided_slice %233 {offsets = [0, 64], sizes = [8, 32], strides = [1, 1]} : vector<8x96xf32> to vector<8x32xf32>
    %252 = vector.broadcast %13 : vector<1x32xf32> to vector<8x32xf32>
    %253 = arith.addf %251, %252 : vector<8x32xf32>
    %254 = arith.mulf %241, %253 : vector<8x32xf32>
    %255 = arith.addf %250, %254 : vector<8x32xf32>
    %256 = math.tanh %255 : vector<8x32xf32>
    %cst_78 = arith.constant 1.000000e+00 : f32
    %257 = vector.broadcast %cst_78 : f32 to vector<8x32xf32>
    %258 = arith.subf %257, %249 : vector<8x32xf32>
    %259 = arith.mulf %258, %256 : vector<8x32xf32>
    %260 = arith.mulf %249, %192 : vector<8x32xf32>
    %261 = arith.addf %259, %260 : vector<8x32xf32>
    %c0_79 = arith.constant 0 : index
    %c0_80 = arith.constant 0 : index
    %262 = vector.load %arg7[%c0_79, %c0_80] : memref<32x96xf32, #tpu.memory_space<vmem>>, vector<32x96xf32>
    %cst_81 = arith.constant dense<0.000000e+00> : vector<8x96xf32>
    %263 = tpu.matmul %222, %262, %cst_81 {dimension_numbers = #tpu.dot_dimension_numbers<[1], [0], [0], [1], [0, 0, 1, 1], [], []>} : vector<8x32xf32>, vector<32x96xf32>, vector<8x96xf32> -> vector<8x96xf32>
    %264 = vector.extract_strided_slice %231 {offsets = [0, 0], sizes = [8, 32], strides = [1, 1]} : vector<8x96xf32> to vector<8x32xf32>
    %265 = vector.extract_strided_slice %263 {offsets = [0, 0], sizes = [8, 32], strides = [1, 1]} : vector<8x96xf32> to vector<8x32xf32>
    %266 = arith.addf %264, %265 : vector<8x32xf32>
    %267 = arith.negf %266 : vector<8x32xf32>
    %268 = math.exp %267 : vector<8x32xf32>
    %cst_82 = arith.constant 1.000000e+00 : f32
    %269 = vector.broadcast %cst_82 : f32 to vector<8x32xf32>
    %270 = arith.addf %269, %268 : vector<8x32xf32>
    %271 = arith.divf %269, %270 : vector<8x32xf32>
    %272 = vector.extract_strided_slice %231 {offsets = [0, 32], sizes = [8, 32], strides = [1, 1]} : vector<8x96xf32> to vector<8x32xf32>
    %273 = vector.extract_strided_slice %263 {offsets = [0, 32], sizes = [8, 32], strides = [1, 1]} : vector<8x96xf32> to vector<8x32xf32>
    %274 = arith.addf %272, %273 : vector<8x32xf32>
    %275 = arith.negf %274 : vector<8x32xf32>
    %276 = math.exp %275 : vector<8x32xf32>
    %cst_83 = arith.constant 1.000000e+00 : f32
    %277 = vector.broadcast %cst_83 : f32 to vector<8x32xf32>
    %278 = arith.addf %277, %276 : vector<8x32xf32>
    %279 = arith.divf %277, %278 : vector<8x32xf32>
    %280 = vector.extract_strided_slice %231 {offsets = [0, 64], sizes = [8, 32], strides = [1, 1]} : vector<8x96xf32> to vector<8x32xf32>
    %281 = vector.extract_strided_slice %263 {offsets = [0, 64], sizes = [8, 32], strides = [1, 1]} : vector<8x96xf32> to vector<8x32xf32>
    %282 = vector.broadcast %14 : vector<1x32xf32> to vector<8x32xf32>
    %283 = arith.addf %281, %282 : vector<8x32xf32>
    %284 = arith.mulf %271, %283 : vector<8x32xf32>
    %285 = arith.addf %280, %284 : vector<8x32xf32>
    %286 = math.tanh %285 : vector<8x32xf32>
    %cst_84 = arith.constant 1.000000e+00 : f32
    %287 = vector.broadcast %cst_84 : f32 to vector<8x32xf32>
    %288 = arith.subf %287, %279 : vector<8x32xf32>
    %289 = arith.mulf %288, %286 : vector<8x32xf32>
    %290 = arith.mulf %279, %222 : vector<8x32xf32>
    %291 = arith.addf %289, %290 : vector<8x32xf32>
    %c4_i32 = arith.constant 4 : i32
    %c8_i32_85 = arith.constant 8 : i32
    %292 = arith.muli %c4_i32, %c8_i32_85 : i32
    %293 = tpu.assume_multiple %292, 8 : i32
    %c7_i32_86 = arith.constant 7 : i32
    %294 = arith.subi %c7_i32_86, %c4_i32 : i32
    %c8_i32_87 = arith.constant 8 : i32
    %295 = arith.muli %294, %c8_i32_87 : i32
    %296 = tpu.assume_multiple %295, 8 : i32
    %297 = arith.index_cast %293 : i32 to index
    %c0_88 = arith.constant 0 : index
    %298 = vector.load %arg13[%297, %c0_88] : memref<64x96xf32, #tpu.memory_space<vmem>>, vector<8x96xf32>
    %299 = arith.index_cast %296 : i32 to index
    %c0_89 = arith.constant 0 : index
    %300 = vector.load %arg14[%299, %c0_89] : memref<64x96xf32, #tpu.memory_space<vmem>>, vector<8x96xf32>
    %c0_90 = arith.constant 0 : index
    %c0_91 = arith.constant 0 : index
    %301 = vector.load %arg3[%c0_90, %c0_91] : memref<32x96xf32, #tpu.memory_space<vmem>>, vector<32x96xf32>
    %cst_92 = arith.constant dense<0.000000e+00> : vector<8x96xf32>
    %302 = tpu.matmul %261, %301, %cst_92 {dimension_numbers = #tpu.dot_dimension_numbers<[1], [0], [0], [1], [0, 0, 1, 1], [], []>} : vector<8x32xf32>, vector<32x96xf32>, vector<8x96xf32> -> vector<8x96xf32>
    %303 = vector.extract_strided_slice %298 {offsets = [0, 0], sizes = [8, 32], strides = [1, 1]} : vector<8x96xf32> to vector<8x32xf32>
    %304 = vector.extract_strided_slice %302 {offsets = [0, 0], sizes = [8, 32], strides = [1, 1]} : vector<8x96xf32> to vector<8x32xf32>
    %305 = arith.addf %303, %304 : vector<8x32xf32>
    %306 = arith.negf %305 : vector<8x32xf32>
    %307 = math.exp %306 : vector<8x32xf32>
    %cst_93 = arith.constant 1.000000e+00 : f32
    %308 = vector.broadcast %cst_93 : f32 to vector<8x32xf32>
    %309 = arith.addf %308, %307 : vector<8x32xf32>
    %310 = arith.divf %308, %309 : vector<8x32xf32>
    %311 = vector.extract_strided_slice %298 {offsets = [0, 32], sizes = [8, 32], strides = [1, 1]} : vector<8x96xf32> to vector<8x32xf32>
    %312 = vector.extract_strided_slice %302 {offsets = [0, 32], sizes = [8, 32], strides = [1, 1]} : vector<8x96xf32> to vector<8x32xf32>
    %313 = arith.addf %311, %312 : vector<8x32xf32>
    %314 = arith.negf %313 : vector<8x32xf32>
    %315 = math.exp %314 : vector<8x32xf32>
    %cst_94 = arith.constant 1.000000e+00 : f32
    %316 = vector.broadcast %cst_94 : f32 to vector<8x32xf32>
    %317 = arith.addf %316, %315 : vector<8x32xf32>
    %318 = arith.divf %316, %317 : vector<8x32xf32>
    %319 = vector.extract_strided_slice %298 {offsets = [0, 64], sizes = [8, 32], strides = [1, 1]} : vector<8x96xf32> to vector<8x32xf32>
    %320 = vector.extract_strided_slice %302 {offsets = [0, 64], sizes = [8, 32], strides = [1, 1]} : vector<8x96xf32> to vector<8x32xf32>
    %321 = vector.broadcast %13 : vector<1x32xf32> to vector<8x32xf32>
    %322 = arith.addf %320, %321 : vector<8x32xf32>
    %323 = arith.mulf %310, %322 : vector<8x32xf32>
    %324 = arith.addf %319, %323 : vector<8x32xf32>
    %325 = math.tanh %324 : vector<8x32xf32>
    %cst_95 = arith.constant 1.000000e+00 : f32
    %326 = vector.broadcast %cst_95 : f32 to vector<8x32xf32>
    %327 = arith.subf %326, %318 : vector<8x32xf32>
    %328 = arith.mulf %327, %325 : vector<8x32xf32>
    %329 = arith.mulf %318, %261 : vector<8x32xf32>
    %330 = arith.addf %328, %329 : vector<8x32xf32>
    %c0_96 = arith.constant 0 : index
    %c0_97 = arith.constant 0 : index
    %331 = vector.load %arg7[%c0_96, %c0_97] : memref<32x96xf32, #tpu.memory_space<vmem>>, vector<32x96xf32>
    %cst_98 = arith.constant dense<0.000000e+00> : vector<8x96xf32>
    %332 = tpu.matmul %291, %331, %cst_98 {dimension_numbers = #tpu.dot_dimension_numbers<[1], [0], [0], [1], [0, 0, 1, 1], [], []>} : vector<8x32xf32>, vector<32x96xf32>, vector<8x96xf32> -> vector<8x96xf32>
    %333 = vector.extract_strided_slice %300 {offsets = [0, 0], sizes = [8, 32], strides = [1, 1]} : vector<8x96xf32> to vector<8x32xf32>
    %334 = vector.extract_strided_slice %332 {offsets = [0, 0], sizes = [8, 32], strides = [1, 1]} : vector<8x96xf32> to vector<8x32xf32>
    %335 = arith.addf %333, %334 : vector<8x32xf32>
    %336 = arith.negf %335 : vector<8x32xf32>
    %337 = math.exp %336 : vector<8x32xf32>
    %cst_99 = arith.constant 1.000000e+00 : f32
    %338 = vector.broadcast %cst_99 : f32 to vector<8x32xf32>
    %339 = arith.addf %338, %337 : vector<8x32xf32>
    %340 = arith.divf %338, %339 : vector<8x32xf32>
    %341 = vector.extract_strided_slice %300 {offsets = [0, 32], sizes = [8, 32], strides = [1, 1]} : vector<8x96xf32> to vector<8x32xf32>
    %342 = vector.extract_strided_slice %332 {offsets = [0, 32], sizes = [8, 32], strides = [1, 1]} : vector<8x96xf32> to vector<8x32xf32>
    %343 = arith.addf %341, %342 : vector<8x32xf32>
    %344 = arith.negf %343 : vector<8x32xf32>
    %345 = math.exp %344 : vector<8x32xf32>
    %cst_100 = arith.constant 1.000000e+00 : f32
    %346 = vector.broadcast %cst_100 : f32 to vector<8x32xf32>
    %347 = arith.addf %346, %345 : vector<8x32xf32>
    %348 = arith.divf %346, %347 : vector<8x32xf32>
    %349 = vector.extract_strided_slice %300 {offsets = [0, 64], sizes = [8, 32], strides = [1, 1]} : vector<8x96xf32> to vector<8x32xf32>
    %350 = vector.extract_strided_slice %332 {offsets = [0, 64], sizes = [8, 32], strides = [1, 1]} : vector<8x96xf32> to vector<8x32xf32>
    %351 = vector.broadcast %14 : vector<1x32xf32> to vector<8x32xf32>
    %352 = arith.addf %350, %351 : vector<8x32xf32>
    %353 = arith.mulf %340, %352 : vector<8x32xf32>
    %354 = arith.addf %349, %353 : vector<8x32xf32>
    %355 = math.tanh %354 : vector<8x32xf32>
    %cst_101 = arith.constant 1.000000e+00 : f32
    %356 = vector.broadcast %cst_101 : f32 to vector<8x32xf32>
    %357 = arith.subf %356, %348 : vector<8x32xf32>
    %358 = arith.mulf %357, %355 : vector<8x32xf32>
    %359 = arith.mulf %348, %291 : vector<8x32xf32>
    %360 = arith.addf %358, %359 : vector<8x32xf32>
    %c5_i32 = arith.constant 5 : i32
    %c8_i32_102 = arith.constant 8 : i32
    %361 = arith.muli %c5_i32, %c8_i32_102 : i32
    %362 = tpu.assume_multiple %361, 8 : i32
    %c7_i32_103 = arith.constant 7 : i32
    %363 = arith.subi %c7_i32_103, %c5_i32 : i32
    %c8_i32_104 = arith.constant 8 : i32
    %364 = arith.muli %363, %c8_i32_104 : i32
    %365 = tpu.assume_multiple %364, 8 : i32
    %366 = arith.index_cast %362 : i32 to index
    %c0_105 = arith.constant 0 : index
    %367 = vector.load %arg13[%366, %c0_105] : memref<64x96xf32, #tpu.memory_space<vmem>>, vector<8x96xf32>
    %368 = arith.index_cast %365 : i32 to index
    %c0_106 = arith.constant 0 : index
    %369 = vector.load %arg14[%368, %c0_106] : memref<64x96xf32, #tpu.memory_space<vmem>>, vector<8x96xf32>
    %c0_107 = arith.constant 0 : index
    %c0_108 = arith.constant 0 : index
    %370 = vector.load %arg3[%c0_107, %c0_108] : memref<32x96xf32, #tpu.memory_space<vmem>>, vector<32x96xf32>
    %cst_109 = arith.constant dense<0.000000e+00> : vector<8x96xf32>
    %371 = tpu.matmul %330, %370, %cst_109 {dimension_numbers = #tpu.dot_dimension_numbers<[1], [0], [0], [1], [0, 0, 1, 1], [], []>} : vector<8x32xf32>, vector<32x96xf32>, vector<8x96xf32> -> vector<8x96xf32>
    %372 = vector.extract_strided_slice %367 {offsets = [0, 0], sizes = [8, 32], strides = [1, 1]} : vector<8x96xf32> to vector<8x32xf32>
    %373 = vector.extract_strided_slice %371 {offsets = [0, 0], sizes = [8, 32], strides = [1, 1]} : vector<8x96xf32> to vector<8x32xf32>
    %374 = arith.addf %372, %373 : vector<8x32xf32>
    %375 = arith.negf %374 : vector<8x32xf32>
    %376 = math.exp %375 : vector<8x32xf32>
    %cst_110 = arith.constant 1.000000e+00 : f32
    %377 = vector.broadcast %cst_110 : f32 to vector<8x32xf32>
    %378 = arith.addf %377, %376 : vector<8x32xf32>
    %379 = arith.divf %377, %378 : vector<8x32xf32>
    %380 = vector.extract_strided_slice %367 {offsets = [0, 32], sizes = [8, 32], strides = [1, 1]} : vector<8x96xf32> to vector<8x32xf32>
    %381 = vector.extract_strided_slice %371 {offsets = [0, 32], sizes = [8, 32], strides = [1, 1]} : vector<8x96xf32> to vector<8x32xf32>
    %382 = arith.addf %380, %381 : vector<8x32xf32>
    %383 = arith.negf %382 : vector<8x32xf32>
    %384 = math.exp %383 : vector<8x32xf32>
    %cst_111 = arith.constant 1.000000e+00 : f32
    %385 = vector.broadcast %cst_111 : f32 to vector<8x32xf32>
    %386 = arith.addf %385, %384 : vector<8x32xf32>
    %387 = arith.divf %385, %386 : vector<8x32xf32>
    %388 = vector.extract_strided_slice %367 {offsets = [0, 64], sizes = [8, 32], strides = [1, 1]} : vector<8x96xf32> to vector<8x32xf32>
    %389 = vector.extract_strided_slice %371 {offsets = [0, 64], sizes = [8, 32], strides = [1, 1]} : vector<8x96xf32> to vector<8x32xf32>
    %390 = vector.broadcast %13 : vector<1x32xf32> to vector<8x32xf32>
    %391 = arith.addf %389, %390 : vector<8x32xf32>
    %392 = arith.mulf %379, %391 : vector<8x32xf32>
    %393 = arith.addf %388, %392 : vector<8x32xf32>
    %394 = math.tanh %393 : vector<8x32xf32>
    %cst_112 = arith.constant 1.000000e+00 : f32
    %395 = vector.broadcast %cst_112 : f32 to vector<8x32xf32>
    %396 = arith.subf %395, %387 : vector<8x32xf32>
    %397 = arith.mulf %396, %394 : vector<8x32xf32>
    %398 = arith.mulf %387, %330 : vector<8x32xf32>
    %399 = arith.addf %397, %398 : vector<8x32xf32>
    %c0_113 = arith.constant 0 : index
    %c0_114 = arith.constant 0 : index
    %400 = vector.load %arg7[%c0_113, %c0_114] : memref<32x96xf32, #tpu.memory_space<vmem>>, vector<32x96xf32>
    %cst_115 = arith.constant dense<0.000000e+00> : vector<8x96xf32>
    %401 = tpu.matmul %360, %400, %cst_115 {dimension_numbers = #tpu.dot_dimension_numbers<[1], [0], [0], [1], [0, 0, 1, 1], [], []>} : vector<8x32xf32>, vector<32x96xf32>, vector<8x96xf32> -> vector<8x96xf32>
    %402 = vector.extract_strided_slice %369 {offsets = [0, 0], sizes = [8, 32], strides = [1, 1]} : vector<8x96xf32> to vector<8x32xf32>
    %403 = vector.extract_strided_slice %401 {offsets = [0, 0], sizes = [8, 32], strides = [1, 1]} : vector<8x96xf32> to vector<8x32xf32>
    %404 = arith.addf %402, %403 : vector<8x32xf32>
    %405 = arith.negf %404 : vector<8x32xf32>
    %406 = math.exp %405 : vector<8x32xf32>
    %cst_116 = arith.constant 1.000000e+00 : f32
    %407 = vector.broadcast %cst_116 : f32 to vector<8x32xf32>
    %408 = arith.addf %407, %406 : vector<8x32xf32>
    %409 = arith.divf %407, %408 : vector<8x32xf32>
    %410 = vector.extract_strided_slice %369 {offsets = [0, 32], sizes = [8, 32], strides = [1, 1]} : vector<8x96xf32> to vector<8x32xf32>
    %411 = vector.extract_strided_slice %401 {offsets = [0, 32], sizes = [8, 32], strides = [1, 1]} : vector<8x96xf32> to vector<8x32xf32>
    %412 = arith.addf %410, %411 : vector<8x32xf32>
    %413 = arith.negf %412 : vector<8x32xf32>
    %414 = math.exp %413 : vector<8x32xf32>
    %cst_117 = arith.constant 1.000000e+00 : f32
    %415 = vector.broadcast %cst_117 : f32 to vector<8x32xf32>
    %416 = arith.addf %415, %414 : vector<8x32xf32>
    %417 = arith.divf %415, %416 : vector<8x32xf32>
    %418 = vector.extract_strided_slice %369 {offsets = [0, 64], sizes = [8, 32], strides = [1, 1]} : vector<8x96xf32> to vector<8x32xf32>
    %419 = vector.extract_strided_slice %401 {offsets = [0, 64], sizes = [8, 32], strides = [1, 1]} : vector<8x96xf32> to vector<8x32xf32>
    %420 = vector.broadcast %14 : vector<1x32xf32> to vector<8x32xf32>
    %421 = arith.addf %419, %420 : vector<8x32xf32>
    %422 = arith.mulf %409, %421 : vector<8x32xf32>
    %423 = arith.addf %418, %422 : vector<8x32xf32>
    %424 = math.tanh %423 : vector<8x32xf32>
    %cst_118 = arith.constant 1.000000e+00 : f32
    %425 = vector.broadcast %cst_118 : f32 to vector<8x32xf32>
    %426 = arith.subf %425, %417 : vector<8x32xf32>
    %427 = arith.mulf %426, %424 : vector<8x32xf32>
    %428 = arith.mulf %417, %360 : vector<8x32xf32>
    %429 = arith.addf %427, %428 : vector<8x32xf32>
    %c6_i32 = arith.constant 6 : i32
    %c8_i32_119 = arith.constant 8 : i32
    %430 = arith.muli %c6_i32, %c8_i32_119 : i32
    %431 = tpu.assume_multiple %430, 8 : i32
    %c7_i32_120 = arith.constant 7 : i32
    %432 = arith.subi %c7_i32_120, %c6_i32 : i32
    %c8_i32_121 = arith.constant 8 : i32
    %433 = arith.muli %432, %c8_i32_121 : i32
    %434 = tpu.assume_multiple %433, 8 : i32
    %435 = arith.index_cast %431 : i32 to index
    %c0_122 = arith.constant 0 : index
    %436 = vector.load %arg13[%435, %c0_122] : memref<64x96xf32, #tpu.memory_space<vmem>>, vector<8x96xf32>
    %437 = arith.index_cast %434 : i32 to index
    %c0_123 = arith.constant 0 : index
    %438 = vector.load %arg14[%437, %c0_123] : memref<64x96xf32, #tpu.memory_space<vmem>>, vector<8x96xf32>
    %c0_124 = arith.constant 0 : index
    %c0_125 = arith.constant 0 : index
    %439 = vector.load %arg3[%c0_124, %c0_125] : memref<32x96xf32, #tpu.memory_space<vmem>>, vector<32x96xf32>
    %cst_126 = arith.constant dense<0.000000e+00> : vector<8x96xf32>
    %440 = tpu.matmul %399, %439, %cst_126 {dimension_numbers = #tpu.dot_dimension_numbers<[1], [0], [0], [1], [0, 0, 1, 1], [], []>} : vector<8x32xf32>, vector<32x96xf32>, vector<8x96xf32> -> vector<8x96xf32>
    %441 = vector.extract_strided_slice %436 {offsets = [0, 0], sizes = [8, 32], strides = [1, 1]} : vector<8x96xf32> to vector<8x32xf32>
    %442 = vector.extract_strided_slice %440 {offsets = [0, 0], sizes = [8, 32], strides = [1, 1]} : vector<8x96xf32> to vector<8x32xf32>
    %443 = arith.addf %441, %442 : vector<8x32xf32>
    %444 = arith.negf %443 : vector<8x32xf32>
    %445 = math.exp %444 : vector<8x32xf32>
    %cst_127 = arith.constant 1.000000e+00 : f32
    %446 = vector.broadcast %cst_127 : f32 to vector<8x32xf32>
    %447 = arith.addf %446, %445 : vector<8x32xf32>
    %448 = arith.divf %446, %447 : vector<8x32xf32>
    %449 = vector.extract_strided_slice %436 {offsets = [0, 32], sizes = [8, 32], strides = [1, 1]} : vector<8x96xf32> to vector<8x32xf32>
    %450 = vector.extract_strided_slice %440 {offsets = [0, 32], sizes = [8, 32], strides = [1, 1]} : vector<8x96xf32> to vector<8x32xf32>
    %451 = arith.addf %449, %450 : vector<8x32xf32>
    %452 = arith.negf %451 : vector<8x32xf32>
    %453 = math.exp %452 : vector<8x32xf32>
    %cst_128 = arith.constant 1.000000e+00 : f32
    %454 = vector.broadcast %cst_128 : f32 to vector<8x32xf32>
    %455 = arith.addf %454, %453 : vector<8x32xf32>
    %456 = arith.divf %454, %455 : vector<8x32xf32>
    %457 = vector.extract_strided_slice %436 {offsets = [0, 64], sizes = [8, 32], strides = [1, 1]} : vector<8x96xf32> to vector<8x32xf32>
    %458 = vector.extract_strided_slice %440 {offsets = [0, 64], sizes = [8, 32], strides = [1, 1]} : vector<8x96xf32> to vector<8x32xf32>
    %459 = vector.broadcast %13 : vector<1x32xf32> to vector<8x32xf32>
    %460 = arith.addf %458, %459 : vector<8x32xf32>
    %461 = arith.mulf %448, %460 : vector<8x32xf32>
    %462 = arith.addf %457, %461 : vector<8x32xf32>
    %463 = math.tanh %462 : vector<8x32xf32>
    %cst_129 = arith.constant 1.000000e+00 : f32
    %464 = vector.broadcast %cst_129 : f32 to vector<8x32xf32>
    %465 = arith.subf %464, %456 : vector<8x32xf32>
    %466 = arith.mulf %465, %463 : vector<8x32xf32>
    %467 = arith.mulf %456, %399 : vector<8x32xf32>
    %468 = arith.addf %466, %467 : vector<8x32xf32>
    %c0_130 = arith.constant 0 : index
    %c0_131 = arith.constant 0 : index
    %469 = vector.load %arg7[%c0_130, %c0_131] : memref<32x96xf32, #tpu.memory_space<vmem>>, vector<32x96xf32>
    %cst_132 = arith.constant dense<0.000000e+00> : vector<8x96xf32>
    %470 = tpu.matmul %429, %469, %cst_132 {dimension_numbers = #tpu.dot_dimension_numbers<[1], [0], [0], [1], [0, 0, 1, 1], [], []>} : vector<8x32xf32>, vector<32x96xf32>, vector<8x96xf32> -> vector<8x96xf32>
    %471 = vector.extract_strided_slice %438 {offsets = [0, 0], sizes = [8, 32], strides = [1, 1]} : vector<8x96xf32> to vector<8x32xf32>
    %472 = vector.extract_strided_slice %470 {offsets = [0, 0], sizes = [8, 32], strides = [1, 1]} : vector<8x96xf32> to vector<8x32xf32>
    %473 = arith.addf %471, %472 : vector<8x32xf32>
    %474 = arith.negf %473 : vector<8x32xf32>
    %475 = math.exp %474 : vector<8x32xf32>
    %cst_133 = arith.constant 1.000000e+00 : f32
    %476 = vector.broadcast %cst_133 : f32 to vector<8x32xf32>
    %477 = arith.addf %476, %475 : vector<8x32xf32>
    %478 = arith.divf %476, %477 : vector<8x32xf32>
    %479 = vector.extract_strided_slice %438 {offsets = [0, 32], sizes = [8, 32], strides = [1, 1]} : vector<8x96xf32> to vector<8x32xf32>
    %480 = vector.extract_strided_slice %470 {offsets = [0, 32], sizes = [8, 32], strides = [1, 1]} : vector<8x96xf32> to vector<8x32xf32>
    %481 = arith.addf %479, %480 : vector<8x32xf32>
    %482 = arith.negf %481 : vector<8x32xf32>
    %483 = math.exp %482 : vector<8x32xf32>
    %cst_134 = arith.constant 1.000000e+00 : f32
    %484 = vector.broadcast %cst_134 : f32 to vector<8x32xf32>
    %485 = arith.addf %484, %483 : vector<8x32xf32>
    %486 = arith.divf %484, %485 : vector<8x32xf32>
    %487 = vector.extract_strided_slice %438 {offsets = [0, 64], sizes = [8, 32], strides = [1, 1]} : vector<8x96xf32> to vector<8x32xf32>
    %488 = vector.extract_strided_slice %470 {offsets = [0, 64], sizes = [8, 32], strides = [1, 1]} : vector<8x96xf32> to vector<8x32xf32>
    %489 = vector.broadcast %14 : vector<1x32xf32> to vector<8x32xf32>
    %490 = arith.addf %488, %489 : vector<8x32xf32>
    %491 = arith.mulf %478, %490 : vector<8x32xf32>
    %492 = arith.addf %487, %491 : vector<8x32xf32>
    %493 = math.tanh %492 : vector<8x32xf32>
    %cst_135 = arith.constant 1.000000e+00 : f32
    %494 = vector.broadcast %cst_135 : f32 to vector<8x32xf32>
    %495 = arith.subf %494, %486 : vector<8x32xf32>
    %496 = arith.mulf %495, %493 : vector<8x32xf32>
    %497 = arith.mulf %486, %429 : vector<8x32xf32>
    %498 = arith.addf %496, %497 : vector<8x32xf32>
    %c7_i32_136 = arith.constant 7 : i32
    %c8_i32_137 = arith.constant 8 : i32
    %499 = arith.muli %c7_i32_136, %c8_i32_137 : i32
    %500 = tpu.assume_multiple %499, 8 : i32
    %c7_i32_138 = arith.constant 7 : i32
    %501 = arith.subi %c7_i32_138, %c7_i32_136 : i32
    %c8_i32_139 = arith.constant 8 : i32
    %502 = arith.muli %501, %c8_i32_139 : i32
    %503 = tpu.assume_multiple %502, 8 : i32
    %504 = arith.index_cast %500 : i32 to index
    %c0_140 = arith.constant 0 : index
    %505 = vector.load %arg13[%504, %c0_140] : memref<64x96xf32, #tpu.memory_space<vmem>>, vector<8x96xf32>
    %506 = arith.index_cast %503 : i32 to index
    %c0_141 = arith.constant 0 : index
    %507 = vector.load %arg14[%506, %c0_141] : memref<64x96xf32, #tpu.memory_space<vmem>>, vector<8x96xf32>
    %c0_142 = arith.constant 0 : index
    %c0_143 = arith.constant 0 : index
    %508 = vector.load %arg3[%c0_142, %c0_143] : memref<32x96xf32, #tpu.memory_space<vmem>>, vector<32x96xf32>
    %cst_144 = arith.constant dense<0.000000e+00> : vector<8x96xf32>
    %509 = tpu.matmul %468, %508, %cst_144 {dimension_numbers = #tpu.dot_dimension_numbers<[1], [0], [0], [1], [0, 0, 1, 1], [], []>} : vector<8x32xf32>, vector<32x96xf32>, vector<8x96xf32> -> vector<8x96xf32>
    %510 = vector.extract_strided_slice %505 {offsets = [0, 0], sizes = [8, 32], strides = [1, 1]} : vector<8x96xf32> to vector<8x32xf32>
    %511 = vector.extract_strided_slice %509 {offsets = [0, 0], sizes = [8, 32], strides = [1, 1]} : vector<8x96xf32> to vector<8x32xf32>
    %512 = arith.addf %510, %511 : vector<8x32xf32>
    %513 = arith.negf %512 : vector<8x32xf32>
    %514 = math.exp %513 : vector<8x32xf32>
    %cst_145 = arith.constant 1.000000e+00 : f32
    %515 = vector.broadcast %cst_145 : f32 to vector<8x32xf32>
    %516 = arith.addf %515, %514 : vector<8x32xf32>
    %517 = arith.divf %515, %516 : vector<8x32xf32>
    %518 = vector.extract_strided_slice %505 {offsets = [0, 32], sizes = [8, 32], strides = [1, 1]} : vector<8x96xf32> to vector<8x32xf32>
    %519 = vector.extract_strided_slice %509 {offsets = [0, 32], sizes = [8, 32], strides = [1, 1]} : vector<8x96xf32> to vector<8x32xf32>
    %520 = arith.addf %518, %519 : vector<8x32xf32>
    %521 = arith.negf %520 : vector<8x32xf32>
    %522 = math.exp %521 : vector<8x32xf32>
    %cst_146 = arith.constant 1.000000e+00 : f32
    %523 = vector.broadcast %cst_146 : f32 to vector<8x32xf32>
    %524 = arith.addf %523, %522 : vector<8x32xf32>
    %525 = arith.divf %523, %524 : vector<8x32xf32>
    %526 = vector.extract_strided_slice %505 {offsets = [0, 64], sizes = [8, 32], strides = [1, 1]} : vector<8x96xf32> to vector<8x32xf32>
    %527 = vector.extract_strided_slice %509 {offsets = [0, 64], sizes = [8, 32], strides = [1, 1]} : vector<8x96xf32> to vector<8x32xf32>
    %528 = vector.broadcast %13 : vector<1x32xf32> to vector<8x32xf32>
    %529 = arith.addf %527, %528 : vector<8x32xf32>
    %530 = arith.mulf %517, %529 : vector<8x32xf32>
    %531 = arith.addf %526, %530 : vector<8x32xf32>
    %532 = math.tanh %531 : vector<8x32xf32>
    %cst_147 = arith.constant 1.000000e+00 : f32
    %533 = vector.broadcast %cst_147 : f32 to vector<8x32xf32>
    %534 = arith.subf %533, %525 : vector<8x32xf32>
    %535 = arith.mulf %534, %532 : vector<8x32xf32>
    %536 = arith.mulf %525, %468 : vector<8x32xf32>
    %537 = arith.addf %535, %536 : vector<8x32xf32>
    %c0_148 = arith.constant 0 : index
    %c0_149 = arith.constant 0 : index
    %538 = vector.load %arg7[%c0_148, %c0_149] : memref<32x96xf32, #tpu.memory_space<vmem>>, vector<32x96xf32>
    %cst_150 = arith.constant dense<0.000000e+00> : vector<8x96xf32>
    %539 = tpu.matmul %498, %538, %cst_150 {dimension_numbers = #tpu.dot_dimension_numbers<[1], [0], [0], [1], [0, 0, 1, 1], [], []>} : vector<8x32xf32>, vector<32x96xf32>, vector<8x96xf32> -> vector<8x96xf32>
    %540 = vector.extract_strided_slice %507 {offsets = [0, 0], sizes = [8, 32], strides = [1, 1]} : vector<8x96xf32> to vector<8x32xf32>
    %541 = vector.extract_strided_slice %539 {offsets = [0, 0], sizes = [8, 32], strides = [1, 1]} : vector<8x96xf32> to vector<8x32xf32>
    %542 = arith.addf %540, %541 : vector<8x32xf32>
    %543 = arith.negf %542 : vector<8x32xf32>
    %544 = math.exp %543 : vector<8x32xf32>
    %cst_151 = arith.constant 1.000000e+00 : f32
    %545 = vector.broadcast %cst_151 : f32 to vector<8x32xf32>
    %546 = arith.addf %545, %544 : vector<8x32xf32>
    %547 = arith.divf %545, %546 : vector<8x32xf32>
    %548 = vector.extract_strided_slice %507 {offsets = [0, 32], sizes = [8, 32], strides = [1, 1]} : vector<8x96xf32> to vector<8x32xf32>
    %549 = vector.extract_strided_slice %539 {offsets = [0, 32], sizes = [8, 32], strides = [1, 1]} : vector<8x96xf32> to vector<8x32xf32>
    %550 = arith.addf %548, %549 : vector<8x32xf32>
    %551 = arith.negf %550 : vector<8x32xf32>
    %552 = math.exp %551 : vector<8x32xf32>
    %cst_152 = arith.constant 1.000000e+00 : f32
    %553 = vector.broadcast %cst_152 : f32 to vector<8x32xf32>
    %554 = arith.addf %553, %552 : vector<8x32xf32>
    %555 = arith.divf %553, %554 : vector<8x32xf32>
    %556 = vector.extract_strided_slice %507 {offsets = [0, 64], sizes = [8, 32], strides = [1, 1]} : vector<8x96xf32> to vector<8x32xf32>
    %557 = vector.extract_strided_slice %539 {offsets = [0, 64], sizes = [8, 32], strides = [1, 1]} : vector<8x96xf32> to vector<8x32xf32>
    %558 = vector.broadcast %14 : vector<1x32xf32> to vector<8x32xf32>
    %559 = arith.addf %557, %558 : vector<8x32xf32>
    %560 = arith.mulf %547, %559 : vector<8x32xf32>
    %561 = arith.addf %556, %560 : vector<8x32xf32>
    %562 = math.tanh %561 : vector<8x32xf32>
    %cst_153 = arith.constant 1.000000e+00 : f32
    %563 = vector.broadcast %cst_153 : f32 to vector<8x32xf32>
    %564 = arith.subf %563, %555 : vector<8x32xf32>
    %565 = arith.mulf %564, %562 : vector<8x32xf32>
    %566 = arith.mulf %555, %498 : vector<8x32xf32>
    %567 = arith.addf %565, %566 : vector<8x32xf32>
    %c8_i32_154 = arith.constant 8 : i32
    %cst_155 = arith.constant 0.000000e+00 : f32
    %568 = vector.broadcast %cst_155 : f32 to vector<8x32xf32>
    %569 = arith.maximumf %537, %568 : vector<8x32xf32>
    %cst_156 = arith.constant 0.000000e+00 : f32
    %570 = vector.broadcast %cst_156 : f32 to vector<8x32xf32>
    %571 = arith.maximumf %567, %570 : vector<8x32xf32>
    %c0_157 = arith.constant 0 : index
    %c0_158 = arith.constant 0 : index
    %572 = vector.load %arg10[%c0_157, %c0_158] : memref<64x128xf32, #tpu.memory_space<vmem>>, vector<32x128xf32>
    %cst_159 = arith.constant dense<0.000000e+00> : vector<8x128xf32>
    %573 = tpu.matmul %569, %572, %cst_159 {dimension_numbers = #tpu.dot_dimension_numbers<[1], [0], [0], [1], [0, 0, 1, 1], [], []>} : vector<8x32xf32>, vector<32x128xf32>, vector<8x128xf32> -> vector<8x128xf32>
    %c32 = arith.constant 32 : index
    %c0_160 = arith.constant 0 : index
    %574 = vector.load %arg10[%c32, %c0_160] : memref<64x128xf32, #tpu.memory_space<vmem>>, vector<32x128xf32>
    %cst_161 = arith.constant dense<0.000000e+00> : vector<8x128xf32>
    %575 = tpu.matmul %571, %574, %cst_161 {dimension_numbers = #tpu.dot_dimension_numbers<[1], [0], [0], [1], [0, 0, 1, 1], [], []>} : vector<8x32xf32>, vector<32x128xf32>, vector<8x128xf32> -> vector<8x128xf32>
    %576 = arith.addf %573, %575 : vector<8x128xf32>
    %c0_162 = arith.constant 0 : index
    %c0_163 = arith.constant 0 : index
    %577 = vector.load %arg11[%c0_162, %c0_163] : memref<1x128xf32, #tpu.memory_space<vmem>>, vector<1x128xf32>
    %578 = vector.broadcast %577 : vector<1x128xf32> to vector<8x128xf32>
    %579 = arith.addf %576, %578 : vector<8x128xf32>
    %c0_164 = arith.constant 0 : index
    %c0_165 = arith.constant 0 : index
    %580 = vector.load %arg12[%c0_164, %c0_165] : memref<8x128xf32, #tpu.memory_space<vmem>>, vector<8x128xf32>
    tpu.vector_store %arg12[%c0_164, %c0_165], %579 {strides = array<i32>} : memref<8x128xf32, #tpu.memory_space<vmem>>, vector<8x128xf32>,
    return
  }
  func.func @transform_0(%arg0: i32) -> (i32, i32) {
    %c0_i32 = arith.constant 0 : i32
    %c0_i32_0 = arith.constant 0 : i32
    %c0_i32_1 = arith.constant 0 : i32
    return %c0_i32, %c0_i32_0 : i32, i32
  }
  func.func @transform_1(%arg0: i32) -> (i32, i32) {
    %c0_i32 = arith.constant 0 : i32
    %c0_i32_0 = arith.constant 0 : i32
    %c0_i32_1 = arith.constant 0 : i32
    return %c0_i32, %c0_i32_0 : i32, i32
  }
  func.func @transform_2(%arg0: i32) -> (i32, i32) {
    %c0_i32 = arith.constant 0 : i32
    %c0_i32_0 = arith.constant 0 : i32
    %c0_i32_1 = arith.constant 0 : i32
    return %c0_i32, %c0_i32_0 : i32, i32
  }
  func.func @transform_3(%arg0: i32) -> (i32, i32) {
    %c0_i32 = arith.constant 0 : i32
    %c0_i32_0 = arith.constant 0 : i32
    %c0_i32_1 = arith.constant 0 : i32
    return %c0_i32, %c0_i32_0 : i32, i32
  }
  func.func @transform_4(%arg0: i32) -> (i32, i32) {
    %c0_i32 = arith.constant 0 : i32
    %c0_i32_0 = arith.constant 0 : i32
    %c0_i32_1 = arith.constant 0 : i32
    return %c0_i32, %c0_i32_0 : i32, i32
  }
  func.func @transform_5(%arg0: i32) -> (i32, i32) {
    %c0_i32 = arith.constant 0 : i32
    %c0_i32_0 = arith.constant 0 : i32
    %c0_i32_1 = arith.constant 0 : i32
    return %c0_i32, %c0_i32_0 : i32, i32
  }
  func.func @transform_6(%arg0: i32) -> (i32, i32) {
    %c0_i32 = arith.constant 0 : i32
    %c0_i32_0 = arith.constant 0 : i32
    %c0_i32_1 = arith.constant 0 : i32
    return %c0_i32, %c0_i32_0 : i32, i32
  }
  func.func @transform_7(%arg0: i32) -> (i32, i32) {
    %c0_i32 = arith.constant 0 : i32
    %c0_i32_0 = arith.constant 0 : i32
    %c0_i32_1 = arith.constant 0 : i32
    return %c0_i32, %c0_i32_0 : i32, i32
  }
  func.func @transform_8(%arg0: i32) -> (i32, i32) {
    %c0_i32 = arith.constant 0 : i32
    %c0_i32_0 = arith.constant 0 : i32
    %c0_i32_1 = arith.constant 0 : i32
    return %c0_i32, %c0_i32_0 : i32, i32
  }
  func.func @transform_9(%arg0: i32) -> (i32, i32) {
    %c0_i32 = arith.constant 0 : i32
    %c0_i32_0 = arith.constant 0 : i32
    %c0_i32_1 = arith.constant 0 : i32
    return %c0_i32, %c0_i32_0 : i32, i32
  }
  func.func @transform_10(%arg0: i32) -> (i32, i32) {
    %c0_i32 = arith.constant 0 : i32
    %c0_i32_0 = arith.constant 0 : i32
    %c0_i32_1 = arith.constant 0 : i32
    return %c0_i32, %c0_i32_0 : i32, i32
  }
  func.func @transform_11(%arg0: i32) -> (i32, i32) {
    %c0_i32 = arith.constant 0 : i32
    %c0_i32_0 = arith.constant 0 : i32
    %c0_i32_1 = arith.constant 0 : i32
    return %c0_i32, %c0_i32_0 : i32, i32
  }
}

</mosaic_0001>

<bundles_post_ra>
// kernel: tpu_custom_call.1
= control target key start
LH: loop header
LB: loop body
LE: loop exit
PB: predicated region body
PF: predicated region fallthrough
CT: control target
= control target key end

     0   :  { %16 = vsyncpa [#allocation5], 0  ;;  %s2103_s0 = inlined_call_operand.vmem [shape: f32[64,32], index: 0, kind: input, shape index: {}]   ;;  %s2104_s1 = inlined_call_operand.vmem [shape: f32[32,96], index: 1, kind: input, shape index: {}]   ;;  %s2105_s2 = inlined_call_operand.hbm [shape: f32[32,96], index: 2, kind: input, shape index: {}]   ;;  %s2106_s3 = inlined_call_operand.vmem [shape: f32[1,96], index: 3, kind: input, shape index: {}]   ;;  %s2107_s4 = inlined_call_operand.vmem [shape: f32[1,32], index: 4, kind: input, shape index: {}]   ;;  %s2108_s5 = inlined_call_operand.hbm [shape: f32[32,96], index: 5, kind: input, shape index: {}]   ;;  %s2109_s6 = inlined_call_operand.hbm [shape: f32[32,96], index: 6, kind: input, shape index: {}]   ;;  %s2110_s7 = inlined_call_operand.vmem [shape: f32[1,96], index: 7, kind: input, shape index: {}]   ;;  %s2111_s8 = inlined_call_operand.vmem [shape: f32[1,32], index: 8, kind: input, shape index: {}]   ;;  %s2112_s9 = inlined_call_operand.vmem [shape: f32[64,128], index: 9, kind: input, shape index: {}]   ;;  %s2113_s10 = inlined_call_operand.vmem [shape: f32[1,128], index: 10, kind: input, shape index: {}]   ;;  %s2114_s11 = inlined_call_operand.hbm [shape: f32[8,128], index: 11, kind: output, shape index: {}]  }
   0x1   :  { %17 = vsyncpa [#allocation8], 0 }
   0x2   :  { %18 = vsyncpa [#allocation6], 0  ;;  %s44_s19 = sshll.u32 %s2108_s5, 4  ;;  %s1670_s20 = smov [#allocation7]   ;;  %s45_s19 = int_to_ptr.hbm [resolvable:$true] %s44_s19 }
   0x3   :  { %s46_s21 = sshll.u32 %s1670_s20, 4  ;;  %s27_s24 = sshll.u32 %s2105_s2, 4  ;;  %s47_s21 = int_to_ptr.vmem [resolvable:$true] %s46_s21  ;;  %s28_s24 = int_to_ptr.hbm [resolvable:$true] %s27_s24 }
   0x4   :  { %s1671_s25 = smov 128   ;;  %s1672_s26 = smov 8  }
   0x5   :  { %52 = dma.hbm_to_vmem [thread:$0]  %s45_s19, 512, %s47_s21, [#allocation8], %s1671_s25, %s1671_s25, %s1672_s26  }
   0x6   :  { %s1673_s27 = smov [#allocation4]   ;;  %s57_s12 = sshll.u32 %s2109_s6, 4  ;;  %s58_s12 = int_to_ptr.hbm [resolvable:$true] %s57_s12 }
   0x7   :  { %s29_s28 = sshll.u32 %s1673_s27, 4  ;;  %s1674_s5 = smov [#allocation9]   ;;  %s30_s28 = int_to_ptr.vmem [resolvable:$true] %s29_s28 }
   0x8   :  { %35 = dma.hbm_to_vmem [thread:$0]  %s28_s24, 512, %s30_s28, [#allocation5], %s1671_s25, %s1671_s25, %s1672_s26  }
   0x9   :  { %s59_s13 = sshll.u32 %s1674_s5, 4  ;;  %s60_s13 = int_to_ptr.vmem [resolvable:$true] %s59_s13 }
   0xa   :  { %65 = dma.hbm_to_vmem [thread:$0]  %s58_s12, 512, %s60_s13, [#allocation8], %s1671_s25, %s1671_s25, %s1672_s26  }
   0xb   :  { %1664 = dma.done.wait [#allocation5], 512  }
   0xc   :  { %1665 = vsyncadd [#allocation5], 4294966784 }
   0xd   :  { %1666 = dma.done.wait [#allocation8], 1024  }
   0xe   :  { %1667 = vsyncadd [#allocation8], 4294966272  ;;  %v97_v0 = vld [vmem:[%s2104_s1 + $0x18] sm:$0xff]  ;;  %v96_v3 = vld [vmem:[%s2104_s1 + $0x10] sm:$0xff]  ;;  %vm102_vm0 = vcmask 261120   ;;  %v1675_v16 = vmov 0.0  }
   0xf   :  { %v180_v1 = vld [vmem:[#allocation7 + $0x18] sm:$0xff]  ;;  %139 = vmatpush.msra.mxu0 %v97_v0  ;;  %v179_v4 = vld [vmem:[#allocation7 + $0x10] sm:$0xff]  ;;  %v95_v6 = vld [vmem:[%s2104_s1 + $0x8] sm:$0xff]  ;;  %vm168_vm1 = vcmask 785408   ;;  %s1678_s14 = smov [#allocation10]  }
  0x10   :  { %v1751_v2 = vld [vmem:[#allocation4 + $0x18] sm:$0xff]  ;;  %197 = vmatpush.msra.mxu1 %v180_v1  ;;  %v1756_v5 = vld [vmem:[#allocation4 + $0x10] sm:$0xff]  ;;  %v178_v7 = vld [vmem:[#allocation7 + $0x8] sm:$0xff]  ;;  %s1388_s6 = sshll.u32 %s1678_s14, 4  ;;  %s1389_s6 = int_to_ptr.vmem [resolvable:$true] %s1388_s6 }
  0x11   :  { %258 = vmatpush.msra.mxu2 %v1751_v2  ;;  %140 = vmatpush.msra.mxu0 %v96_v3  ;;  %v1762_v8 = vld [vmem:[#allocation4 + $0x8] sm:$0xff]  ;;  %v94_v9 = vld [vmem:[%s2104_s1] sm:$0xff]  ;;  %v1768_v11 = vld [vmem:[#allocation9 + $0x18] sm:$0xff]  ;;  %s1676_s1 = smov 64  }
  0x12   :  { %198 = vmatpush.msra.mxu1 %v179_v4  ;;  %v177_v10 = vld [vmem:[#allocation7] sm:$0xff]  ;;  %327 = vmatpush.msra.mxu3 %v1768_v11  ;;  %v1780_v15 = vld [vmem:[#allocation9 + $0x10] sm:$0xff]  ;;  %v1785_v17 = vld [vmem:[#allocation9 + $0x8] sm:$0xff] }
  0x13   :  { %259 = vmatpush.msra.mxu2 %v1756_v5  ;;  %141 = vmatpush.msra.mxu0 %v95_v6  ;;  %v1770_v12 = vld [vmem:[#allocation4] sm:$0xff]  ;;  %v87_v19 = vld [vmem:[%s2103_s0 + $0x8] sm:$0xff]  ;;  %v88_v21 = vld [vmem:[%s2103_s0 + $0x10] sm:$0xff] }
  0x14   :  { %199 = vmatpush.msra.mxu1 %v178_v7  ;;  %v86_v13 = vld [vmem:[%s2103_s0] sm:$0xff]  ;;  %328 = vmatpush.msra.mxu3 %v1780_v15  ;;  %v89_v22 = vld [vmem:[%s2103_s0 + $0x18] sm:$0xff]  ;;  %v91_v24 = vld [vmem:[%s2103_s0 + $0x28] sm:$0xff] }
  0x15   :  { %260 = vmatpush.msra.mxu2 %v1762_v8  ;;  %v1458_v14 = vld [vmem:[%s2107_s4] ss:$0 sm:$0xff]  ;;  %142 = vmatpush.msra.mxu0 %v94_v9  ;;  %v92_v25 = vld [vmem:[%s2103_s0 + $0x30] sm:$0xff]  ;;  %v93_v26 = vld [vmem:[%s2103_s0 + $0x38] sm:$0xff] }
  0x16   :  { %200 = vmatpush.msra.mxu1 %v177_v10  ;;  %1401 = vmatmul.msk.f32.vlgmr.msra.gmra.mxu0 %vm102_vm0, %v86_v13  ;;  %v1789_v18 = vld [vmem:[#allocation9] sm:$0xff] }
  0x17   :  { %261 = vmatpush.msra.mxu2 %v1770_v12  ;;  %1409 = vmatmul.msk.f32.vlgmr.msra.gmra.mxu1 %vm102_vm0, %v86_v13  ;;  %v1459_v20 = vld [vmem:[%s2111_s8] ss:$0 sm:$0xff] }
  0x18   :  { %262 = vmatmul.f32.vlgmr.msra.gmra.mxu2 %v1675_v16  ;;  %288 = vrot.lane.b32.xlu0 %v1458_v14, %s1676_s1  ;;  %v90_v23 = vld [vmem:[%s2103_s0 + $0x20] sm:$0xff]  ;;  %s1677_s0 = smov 96  }
  0x19   :  { %401 = vmatpush.msrb.mxu2 %v1751_v2  ;;  %329 = vmatpush.msra.mxu3 %v1785_v17  ;;  %v1851_v27 = vld [vmem:[%s2106_s3] ss:$0 sm:$0xff] }
  0x1a   :  { %v1461_v28 = vld [vmem:[%s2110_s7] ss:$0 sm:$0xff] }
  0x1b   :  { %402 = vmatpush.msrb.mxu2 %v1756_v5  ;;  %330 = vmatpush.msra.mxu3 %v1789_v18 }
  0x1c   :  { %331 = vmatmul.f32.vlgmr.msra.gmra.mxu3 %v1675_v16 }
  0x1d   :  { %403 = vmatpush.msrb.mxu2 %v1762_v8  ;;  %466 = vmatpush.msrb.mxu3 %v1768_v11 }
  0x1e   :  { %1402 = vmatmul.msk.f32.gmra.mxu0 %vm102_vm0, %v87_v19 }
  0x1f   :  { %1410 = vmatmul.msk.f32.gmra.mxu1 %vm102_vm0, %v87_v19  ;;  %404 = vmatpush.msrb.mxu2 %v1770_v12 }
  0x20   :  { %357 = vrot.lane.b32.xlu0 %v1459_v20, %s1676_s1  ;;  %467 = vmatpush.msrb.mxu3 %v1780_v15 }
  0x21   :  { %535 = vmatpush.msra.mxu2 %v1751_v2 }
  0x22   :  { %468 = vmatpush.msrb.mxu3 %v1785_v17 }
  0x23   :  { %536 = vmatpush.msra.mxu2 %v1756_v5 }
  0x24   :  { %469 = vmatpush.msrb.mxu3 %v1789_v18 }
  0x25   :  { %537 = vmatpush.msra.mxu2 %v1762_v8 }
  0x26   :  { %600 = vmatpush.msra.mxu3 %v1768_v11  ;;  %1403 = vmatmul.msk.f32.gmra.mxu0 %vm102_vm0, %v88_v21 }
  0x27   :  { %1411 = vmatmul.msk.f32.gmra.mxu1 %vm102_vm0, %v88_v21  ;;  %538 = vmatpush.msra.mxu2 %v1770_v12 }
  0x28   :  { %601 = vmatpush.msra.mxu3 %v1780_v15 }
  0x2a   :  { %602 = vmatpush.msra.mxu3 %v1785_v17 }
  0x2c   :  { %603 = vmatpush.msra.mxu3 %v1789_v18 }
  0x2e   :  { %1404 = vmatmul.msk.f32.gmra.mxu0 %vm102_vm0, %v89_v22 }
  0x2f   :  { %1412 = vmatmul.msk.f32.gmra.mxu1 %vm102_vm0, %v89_v22 }
  0x36   :  { %1405 = vmatmul.msk.f32.gmra.mxu0 %vm102_vm0, %v90_v23 }
  0x37   :  { %1413 = vmatmul.msk.f32.gmra.mxu1 %vm102_vm0, %v90_v23 }
  0x3e   :  { %1406 = vmatmul.msk.f32.gmra.mxu0 %vm102_vm0, %v91_v24 }
  0x3f   :  { %1414 = vmatmul.msk.f32.gmra.mxu1 %vm102_vm0, %v91_v24 }
  0x46   :  { %1407 = vmatmul.msk.f32.gmra.mxu0 %vm102_vm0, %v92_v25 }
  0x47   :  { %1415 = vmatmul.msk.f32.gmra.mxu1 %vm102_vm0, %v92_v25 }
  0x4e   :  { %1408 = vmatmul.msk.f32.gmra.mxu0 %vm102_vm0, %v93_v26 }
  0x4f   :  { %1416 = vmatmul.msk.f32.gmra.mxu1 %vm102_vm0, %v93_v26 }
  0x8a   :  { %v1857_v32 = vpop.permute.xlu0 %288 }
  0x92   :  { %v1863_v38 = vpop.permute.xlu0 %357 }
  0x93   :  { %v144_v29 = vpop.f32.mrf.mxu0 }
  0x94   :  { %v145_v30 = vadd.f32 %v1851_v27, %v144_v29  ;;  %v202_v31 = vpop.f32.mrf.mxu1 }
  0x95   :  { %v203_v33 = vadd.f32 %v1461_v28, %v202_v31 }
  0x96   :  { %169 = vst.msk [vmem:[#allocation2] sm:$0xff] %vm168_vm1, %v145_v30 }
  0x97   :  { %226 = vst.msk [vmem:[#allocation3] sm:$0xff] %vm168_vm1, %v203_v33 }
  0x9b   :  { %v263_v34 = vpop.f32.mrf.mxu2 }
  0x9c   :  { %v291_v35 = vadd.f32 %v1857_v32, %v263_v34  ;;  %v205_v36 = vpop.f32.mrf.mxu1 }
  0x9d   :  { %v206_v37 = vadd.f32 %v1461_v28, %v205_v36  ;;  %v236_v53 = vld [vmem:[#allocation2] sm:$0xff] }
  0x9e   :  { %293 = vrot.lane.b32.xlu1 %v291_v35, %s1676_s1  ;;  %v266_v54 = vadd.f32 %v263_v34, %v236_v53 }
  0x9f   :  { %227 = vst.msk [vmem:[#allocation3 + $0x8] sm:$0xff] %vm168_vm1, %v206_v37  ;;  %v332_v39 = vpop.f32.mrf.mxu3 }
  0xa0   :  { %v360_v40 = vadd.f32 %v1863_v38, %v332_v39  ;;  %v1417_v55 = vmul.f32 -1.442695, %v266_v54 }
  0xa2   :  { %1463 = vpow2.f32 %v1417_v55 }
  0xa4   :  { %v208_v41 = vpop.f32.mrf.mxu1 }
  0xa5   :  { %v209_v42 = vadd.f32 %v1461_v28, %v208_v41 }
  0xa6   :  { %362 = vrot.lane.b32.xlu1 %v360_v40, %s1676_s1 }
  0xa7   :  { %228 = vst.msk [vmem:[#allocation3 + $0x10] sm:$0xff] %vm168_vm1, %v209_v42 }
  0xa8   :  { %v1464_v59 = vpop.eup %1463 }
  0xa9   :  { %v270_v60 = vadd.f32 1.0, %v1464_v59 }
  0xab   :  { %v282_v10 = vand.u32 2147483648, %v270_v60  ;;  %vm276_vm3 = vweird.f32 %v270_v60  ;;  %v280_v13 = vand.u32 2147483647, %v270_v60 }
  0xac   :  { %v211_v43 = vpop.f32.mrf.mxu1 }
  0xad   :  { %v212_v44 = vadd.f32 %v1461_v28, %v211_v43  ;;  %v283_v19 = vor.u32 1.1754944e-38, %v282_v10  ;;  %vm281_vm5 = vcmp.eq.f32.partialorder %v280_v13, 8.507059e+37 }
  0xaf   :  { %229 = vst.msk [vmem:[#allocation3 + $0x18] sm:$0xff] %vm168_vm1, %v212_v44 }
  0xb4   :  { %v214_v45 = vpop.f32.mrf.mxu1 }
  0xb5   :  { %v215_v46 = vadd.f32 %v1461_v28, %v214_v45 }
  0xb7   :  { %230 = vst.msk [vmem:[#allocation3 + $0x20] sm:$0xff] %vm168_vm1, %v215_v46 }
  0xbc   :  { %v217_v47 = vpop.f32.mrf.mxu1 }
  0xbd   :  { %v218_v48 = vadd.f32 %v1461_v28, %v217_v47 }
  0xbf   :  { %231 = vst.msk [vmem:[#allocation3 + $0x28] sm:$0xff] %vm168_vm1, %v218_v48 }
  0xc4   :  { %v220_v49 = vpop.f32.mrf.mxu1 }
  0xc5   :  { %v221_v50 = vadd.f32 %v1461_v28, %v220_v49 }
  0xc7   :  { %232 = vst.msk [vmem:[#allocation3 + $0x30] sm:$0xff] %vm168_vm1, %v221_v50 }
  0xcc   :  { %v223_v51 = vpop.f32.mrf.mxu1 }
  0xcd   :  { %v224_v52 = vadd.f32 %v1461_v28, %v223_v51  ;;  %v147_v51 = vpop.f32.mrf.mxu0 }
  0xcf   :  { %233 = vst.msk [vmem:[#allocation3 + $0x38] sm:$0xff] %vm168_vm1, %v224_v52  ;;  %v148_v52 = vadd.f32 %v1851_v27, %v147_v51 }
  0xd1   :  { %170 = vst.msk [vmem:[#allocation2 + $0x8] sm:$0xff] %vm168_vm1, %v148_v52 }
  0xd6   :  { %v238_v56 = vld [vmem:[#allocation3 + $0x38] sm:$0xff] }
  0xd7   :  { %v335_v57 = vadd.f32 %v332_v39, %v238_v56 }
  0xd9   :  { %v1418_v58 = vmul.f32 -1.442695, %v335_v57 }
  0xdb   :  { %1465 = vpow2.f32 %v1418_v58  ;;  %v381_v58 = vld [vmem:[#allocation2 + $0x8] sm:$0xff] }
  0xdc   :  { %1467 = vrcp.f32 %v270_v60 }
  0xe1   :  { %v1466_v61 = vpop.eup %1465 }
  0xe2   :  { %v339_v62 = vadd.f32 1.0, %v1466_v61  ;;  %v1468_v63 = vpop.eup %1467  ;;  %v383_v61 = vld [vmem:[#allocation3 + $0x30] sm:$0xff] }
  0xe3   :  { %v272_v0 = vmul.f32 %v1468_v63, %v270_v60  ;;  %vm277_vm2 = vweird.f32 %v1468_v63 }
  0xe4   :  { %1469 = vrcp.f32 %v339_v62  ;;  %vm278_vm4 = vmor %vm276_vm3, %vm277_vm2  ;;  %v351_v24 = vand.u32 2147483648, %v339_v62  ;;  %vm345_vm7 = vweird.f32 %v339_v62  ;;  %v349_v25 = vand.u32 2147483647, %v339_v62 }
  0xe5   :  { %v273_v1 = vsub.f32 1.0, %v272_v0 }
  0xe6   :  { %v352_v28 = vor.u32 1.1754944e-38, %v351_v24  ;;  %vm350_vm9 = vcmp.eq.f32.partialorder %v349_v25, 8.507059e+37 }
  0xe7   :  { %v274_v4 = vmul.f32 %v1468_v63, %v273_v1 }
  0xe9   :  { %v275_v7 = vadd.f32 %v1468_v63, %v274_v4 }
  0xea   :  { %v1470_v3 = vpop.eup %1469 }
  0xeb   :  { %v341_v6 = vmul.f32 %v1470_v3, %v339_v62  ;;  %v279_v14 = vsel %vm278_vm4, %v1468_v63, %v275_v7  ;;  %vm346_vm6 = vweird.f32 %v1470_v3 }
  0xec   :  { %v284_v21 = vsel %vm281_vm5, %v283_v19, %v279_v14  ;;  %vm347_vm8 = vmor %vm345_vm7, %vm346_vm6 }
  0xed   :  { %v342_v9 = vsub.f32 1.0, %v341_v6  ;;  %v303_v40 = vsub.f32 1.0, %v284_v21  ;;  %v309_v42 = vmul.f32 0.0, %v284_v21 }
  0xef   :  { %v343_v16 = vmul.f32 %v1470_v3, %v342_v9 }
  0xf1   :  { %v344_v23 = vadd.f32 %v1470_v3, %v343_v16 }
  0xf3   :  { %v348_v26 = vsel %vm347_vm8, %v1470_v3, %v344_v23 }
  0xf4   :  { %v353_v30 = vsel %vm350_vm9, %v352_v28, %v348_v26 }
  0xf5   :  { %v372_v45 = vsub.f32 1.0, %v353_v30  ;;  %v378_v47 = vmul.f32 0.0, %v353_v30 }
 0x110   :  { %v294_v20 = vpop.permute.xlu1 %293 }
 0x111   :  { %v296_v22 = vmul.f32 %v294_v20, %v284_v21 }
 0x113   :  { %298 = vrot.lane.b32.xlu2 %v296_v22, %s1676_s1 }
 0x118   :  { %v363_v29 = vpop.permute.xlu1 %362 }
 0x119   :  { %v365_v31 = vmul.f32 %v363_v29, %v353_v30 }
 0x11b   :  { %367 = vrot.lane.b32.xlu2 %v365_v31, %s1676_s1 }
 0x16d   :  { %v299_v33 = vpop.permute.xlu2 %298 }
 0x16e   :  { %v301_v34 = vadd.f32 %v299_v33, %v236_v53 }
 0x170   :  { %1471 = vtanh.f32 %v301_v34 }
 0x175   :  { %v368_v35 = vpop.permute.xlu2 %367 }
 0x176   :  { %v1472_v36 = vpop.eup %1471  ;;  %v370_v37 = vadd.f32 %v368_v35, %v238_v56 }
 0x177   :  { %305 = vrot.lane.b32.xlu0 %v1472_v36, %s1677_s0 }
 0x178   :  { %1473 = vtanh.f32 %v370_v37 }
 0x17e   :  { %v1474_v39 = vpop.eup %1473 }
 0x17f   :  { %374 = vrot.lane.b32.xlu1 %v1474_v39, %s1677_s0 }
 0x1e9   :  { %v306_v41 = vpop.permute.xlu0 %305 }
 0x1ea   :  { %v308_v43 = vmul.f32 %v306_v41, %v303_v40 }
 0x1ec   :  { %v1878_v44 = vadd.f32 %v309_v42, %v308_v43 }
 0x1ee   :  { %385 = vrot.lane.b32.xlu2 %v1878_v44, %s1677_s0 }
 0x1f1   :  { %v375_v46 = vpop.permute.xlu1 %374 }
 0x1f2   :  { %v377_v48 = vmul.f32 %v375_v46, %v372_v45 }
 0x1f4   :  { %v1882_v49 = vadd.f32 %v378_v47, %v377_v48 }
 0x1f6   :  { %450 = vrot.lane.b32.xlu0 %v1882_v49, %s1677_s0 }
 0x248   :  { %v386_v50 = vpop.permute.xlu2 %385 }
 0x249   :  { %1419 = vmatmul.msk.f32.vlgmr.msrb.gmra.mxu2 %vm102_vm0, %v386_v50 }
 0x24a   :  { %669 = vmatpush.msrb.mxu2 %v1751_v2 }
 0x24c   :  { %670 = vmatpush.msrb.mxu2 %v1756_v5 }
 0x24e   :  { %671 = vmatpush.msrb.mxu2 %v1762_v8 }
 0x250   :  { %672 = vmatpush.msrb.mxu2 %v1770_v12 }
 0x268   :  { %v451_v53 = vpop.permute.xlu0 %450 }
 0x269   :  { %1421 = vmatmul.msk.f32.vlgmr.msrb.gmra.mxu3 %vm102_vm0, %v451_v53 }
 0x26a   :  { %734 = vmatpush.msrb.mxu3 %v1768_v11 }
 0x26c   :  { %735 = vmatpush.msrb.mxu3 %v1780_v15 }
 0x26e   :  { %736 = vmatpush.msrb.mxu3 %v1785_v17 }
 0x270   :  { %737 = vmatpush.msrb.mxu3 %v1789_v18 }
 0x2cc   :  { %v406_v54 = vpop.f32.mrf.mxu2 }
 0x2cd   :  { %v429_v55 = vadd.f32 %v406_v54, %v1857_v32  ;;  %v409_v59 = vadd.f32 %v406_v54, %v381_v58 }
 0x2cf   :  { %431 = vrot.lane.b32.xlu1 %v429_v55, %s1676_s1  ;;  %v1420_v60 = vmul.f32 -1.442695, %v409_v59 }
 0x2d1   :  { %1475 = vpow2.f32 %v1420_v60 }
 0x2d7   :  { %v1476_v0 = vpop.eup %1475 }
 0x2d8   :  { %v413_v1 = vadd.f32 1.0, %v1476_v0 }
 0x2da   :  { %v425_v20 = vand.u32 2147483648, %v413_v1  ;;  %vm419_vm11 = vweird.f32 %v413_v1  ;;  %v423_v21 = vand.u32 2147483647, %v413_v1 }
 0x2dc   :  { %v426_v24 = vor.u32 1.1754944e-38, %v425_v20  ;;  %vm424_vm13 = vcmp.eq.f32.partialorder %v423_v21, 8.507059e+37 }
 0x2ec   :  { %v471_v56 = vpop.f32.mrf.mxu3 }
 0x2ed   :  { %v494_v57 = vadd.f32 %v471_v56, %v1863_v38  ;;  %v474_v62 = vadd.f32 %v471_v56, %v383_v61 }
 0x2ef   :  { %496 = vrot.lane.b32.xlu2 %v494_v57, %s1676_s1  ;;  %v1422_v63 = vmul.f32 -1.442695, %v474_v62  ;;  %v150_v57 = vpop.f32.mrf.mxu0 }
 0x2f1   :  { %1477 = vpow2.f32 %v1422_v63 }
 0x2f2   :  { %1479 = vrcp.f32 %v413_v1 }
 0x2f7   :  { %v1478_v3 = vpop.eup %1477 }
 0x2f8   :  { %v478_v4 = vadd.f32 1.0, %v1478_v3  ;;  %v1480_v6 = vpop.eup %1479  ;;  %v517_v3 = vld [vmem:[#allocation3 + $0x28] sm:$0xff] }
 0x2f9   :  { %v415_v7 = vmul.f32 %v1480_v6, %v413_v1  ;;  %vm420_vm10 = vweird.f32 %v1480_v6 }
 0x2fa   :  { %1481 = vrcp.f32 %v478_v4  ;;  %vm421_vm12 = vmor %vm419_vm11, %vm420_vm10  ;;  %v490_v30 = vand.u32 2147483648, %v478_v4  ;;  %vm484_vm15 = vweird.f32 %v478_v4  ;;  %v488_v31 = vand.u32 2147483647, %v478_v4 }
 0x2fb   :  { %v416_v9 = vsub.f32 1.0, %v415_v7 }
 0x2fc   :  { %v491_v34 = vor.u32 1.1754944e-38, %v490_v30  ;;  %vm489_vm3 = vcmp.eq.f32.partialorder %v488_v31, 8.507059e+37 }
 0x2fd   :  { %v417_v13 = vmul.f32 %v1480_v6, %v416_v9 }
 0x2ff   :  { %v418_v16 = vadd.f32 %v1480_v6, %v417_v13 }
 0x300   :  { %v1482_v10 = vpop.eup %1481 }
 0x301   :  { %v480_v14 = vmul.f32 %v1482_v10, %v478_v4  ;;  %v422_v22 = vsel %vm421_vm12, %v1480_v6, %v418_v16  ;;  %vm485_vm14 = vweird.f32 %v1482_v10 }
 0x302   :  { %v427_v26 = vsel %vm424_vm13, %v426_v24, %v422_v22  ;;  %vm486_vm2 = vmor %vm484_vm15, %vm485_vm14 }
 0x303   :  { %v481_v19 = vsub.f32 1.0, %v480_v14  ;;  %v441_v46 = vsub.f32 1.0, %v427_v26  ;;  %v447_v48 = vmul.f32 %v427_v26, %v1878_v44 }
 0x305   :  { %v482_v23 = vmul.f32 %v1482_v10, %v481_v19 }
 0x307   :  { %v483_v29 = vadd.f32 %v1482_v10, %v482_v23 }
 0x309   :  { %v487_v33 = vsel %vm486_vm2, %v1482_v10, %v483_v29 }
 0x30a   :  { %v492_v35 = vsel %vm489_vm3, %v491_v34, %v487_v33 }
 0x30b   :  { %v506_v52 = vsub.f32 1.0, %v492_v35  ;;  %v512_v54 = vmul.f32 %v492_v35, %v1882_v49 }
 0x341   :  { %v432_v25 = vpop.permute.xlu1 %431 }
 0x342   :  { %v434_v28 = vmul.f32 %v432_v25, %v427_v26 }
 0x344   :  { %436 = vrot.lane.b32.xlu0 %v434_v28, %s1676_s1 }
 0x349   :  { %v497_v36 = vpop.permute.xlu2 %496 }
 0x34a   :  { %v499_v37 = vmul.f32 %v497_v36, %v492_v35 }
 0x34c   :  { %501 = vrot.lane.b32.xlu1 %v499_v37, %s1676_s1 }
 0x3b6   :  { %v437_v39 = vpop.permute.xlu0 %436 }
 0x3b7   :  { %v439_v40 = vadd.f32 %v437_v39, %v381_v58  ;;  %v151_v58 = vadd.f32 %v1851_v27, %v150_v57 }
 0x3b9   :  { %1483 = vtanh.f32 %v439_v40  ;;  %171 = vst.msk [vmem:[#allocation2 + $0x10] sm:$0xff] %vm168_vm1, %v151_v58 }
 0x3be   :  { %v502_v41 = vpop.permute.xlu1 %501 }
 0x3bf   :  { %v1484_v42 = vpop.eup %1483  ;;  %v504_v43 = vadd.f32 %v502_v41, %v383_v61 }
 0x3c0   :  { %443 = vrot.lane.b32.xlu2 %v1484_v42, %s1677_s0  ;;  %v515_v63 = vld [vmem:[#allocation2 + $0x10] sm:$0xff] }
 0x3c1   :  { %1485 = vtanh.f32 %v504_v43 }
 0x3c7   :  { %v1486_v45 = vpop.eup %1485 }
 0x3c8   :  { %508 = vrot.lane.b32.xlu0 %v1486_v45, %s1677_s0 }
 0x41a   :  { %v444_v47 = vpop.permute.xlu2 %443 }
 0x41b   :  { %v446_v50 = vmul.f32 %v444_v47, %v441_v46 }
 0x41d   :  { %v1907_v51 = vadd.f32 %v447_v48, %v446_v50 }
 0x41f   :  { %519 = vrot.lane.b32.xlu1 %v1907_v51, %s1677_s0 }
 0x43a   :  { %v509_v53 = vpop.permute.xlu0 %508 }
 0x43b   :  { %v511_v55 = vmul.f32 %v509_v53, %v506_v52 }
 0x43d   :  { %v1912_v56 = vadd.f32 %v512_v54, %v511_v55 }
 0x43f   :  { %584 = vrot.lane.b32.xlu2 %v1912_v56, %s1677_s0 }
 0x491   :  { %v520_v44 = vpop.permute.xlu1 %519 }
 0x492   :  { %1423 = vmatmul.msk.f32.vlgmr.msra.gmra.mxu2 %vm102_vm0, %v520_v44 }
 0x493   :  { %803 = vmatpush.msra.mxu2 %v1751_v2 }
 0x495   :  { %804 = vmatpush.msra.mxu2 %v1756_v5 }
 0x497   :  { %805 = vmatpush.msra.mxu2 %v1762_v8 }
 0x499   :  { %v585_v49 = vpop.permute.xlu2 %584  ;;  %806 = vmatpush.msra.mxu2 %v1770_v12 }
 0x49a   :  { %1425 = vmatmul.msk.f32.vlgmr.msra.gmra.mxu3 %vm102_vm0, %v585_v49 }
 0x49b   :  { %868 = vmatpush.msra.mxu3 %v1768_v11 }
 0x49d   :  { %869 = vmatpush.msra.mxu3 %v1780_v15 }
 0x49f   :  { %870 = vmatpush.msra.mxu3 %v1785_v17 }
 0x4a1   :  { %871 = vmatpush.msra.mxu3 %v1789_v18 }
 0x515   :  { %v540_v59 = vpop.f32.mrf.mxu2 }
 0x516   :  { %v563_v60 = vadd.f32 %v540_v59, %v1857_v32  ;;  %v543_v0 = vadd.f32 %v540_v59, %v515_v63 }
 0x518   :  { %565 = vrot.lane.b32.xlu0 %v563_v60, %s1676_s1  ;;  %v1424_v1 = vmul.f32 -1.442695, %v543_v0 }
 0x51a   :  { %1487 = vpow2.f32 %v1424_v1 }
 0x51d   :  { %v605_v61 = vpop.f32.mrf.mxu3 }
 0x51e   :  { %v628_v62 = vadd.f32 %v605_v61, %v1863_v38  ;;  %v608_v4 = vadd.f32 %v605_v61, %v517_v3 }
 0x520   :  { %630 = vrot.lane.b32.xlu1 %v628_v62, %s1676_s1  ;;  %v1426_v6 = vmul.f32 -1.442695, %v608_v4  ;;  %v1488_v7 = vpop.eup %1487  ;;  %v153_v62 = vpop.f32.mrf.mxu0 }
 0x521   :  { %v547_v9 = vadd.f32 1.0, %v1488_v7 }
 0x522   :  { %1489 = vpow2.f32 %v1426_v6 }
 0x523   :  { %1491 = vrcp.f32 %v547_v9  ;;  %v559_v25 = vand.u32 2147483648, %v547_v9  ;;  %vm553_vm5 = vweird.f32 %v547_v9  ;;  %v557_v26 = vand.u32 2147483647, %v547_v9 }
 0x525   :  { %v560_v30 = vor.u32 1.1754944e-38, %v559_v25  ;;  %vm558_vm7 = vcmp.eq.f32.partialorder %v557_v26, 8.507059e+37 }
 0x528   :  { %v1490_v10 = vpop.eup %1489 }
 0x529   :  { %v612_v13 = vadd.f32 1.0, %v1490_v10  ;;  %v1492_v14 = vpop.eup %1491 }
 0x52a   :  { %v549_v16 = vmul.f32 %v1492_v14, %v547_v9  ;;  %vm554_vm4 = vweird.f32 %v1492_v14 }
 0x52b   :  { %1493 = vrcp.f32 %v612_v13  ;;  %vm555_vm6 = vmor %vm553_vm5, %vm554_vm4  ;;  %v624_v36 = vand.u32 2147483648, %v612_v13  ;;  %vm618_vm9 = vweird.f32 %v612_v13  ;;  %v622_v37 = vand.u32 2147483647, %v612_v13 }
 0x52c   :  { %v550_v19 = vsub.f32 1.0, %v549_v16 }
 0x52d   :  { %v625_v40 = vor.u32 1.1754944e-38, %v624_v36  ;;  %vm623_vm11 = vcmp.eq.f32.partialorder %v622_v37, 8.507059e+37 }
 0x52e   :  { %v551_v21 = vmul.f32 %v1492_v14, %v550_v19  ;;  %v651_v19 = vld [vmem:[#allocation3 + $0x20] sm:$0xff] }
 0x530   :  { %v552_v23 = vadd.f32 %v1492_v14, %v551_v21 }
 0x531   :  { %v1494_v20 = vpop.eup %1493 }
 0x532   :  { %v614_v22 = vmul.f32 %v1494_v20, %v612_v13  ;;  %v556_v28 = vsel %vm555_vm6, %v1492_v14, %v552_v23  ;;  %vm619_vm8 = vweird.f32 %v1494_v20 }
 0x533   :  { %v561_v33 = vsel %vm558_vm7, %v560_v30, %v556_v28  ;;  %vm620_vm10 = vmor %vm618_vm9, %vm619_vm8 }
 0x534   :  { %v615_v24 = vsub.f32 1.0, %v614_v22  ;;  %v575_v53 = vsub.f32 1.0, %v561_v33  ;;  %v581_v55 = vmul.f32 %v561_v33, %v1907_v51 }
 0x536   :  { %v616_v29 = vmul.f32 %v1494_v20, %v615_v24 }
 0x538   :  { %v617_v35 = vadd.f32 %v1494_v20, %v616_v29 }
 0x53a   :  { %v621_v39 = vsel %vm620_vm10, %v1494_v20, %v617_v35 }
 0x53b   :  { %v626_v42 = vsel %vm623_vm11, %v625_v40, %v621_v39 }
 0x53c   :  { %v640_v44 = vsub.f32 1.0, %v626_v42  ;;  %v646_v59 = vmul.f32 %v626_v42, %v1912_v56 }
 0x58a   :  { %v566_v31 = vpop.permute.xlu0 %565 }
 0x58b   :  { %v568_v34 = vmul.f32 %v566_v31, %v561_v33 }
 0x58d   :  { %570 = vrot.lane.b32.xlu2 %v568_v34, %s1676_s1 }
 0x592   :  { %v631_v41 = vpop.permute.xlu1 %630 }
 0x593   :  { %v633_v43 = vmul.f32 %v631_v41, %v626_v42 }
 0x595   :  { %635 = vrot.lane.b32.xlu0 %v633_v43, %s1676_s1 }
 0x5e7   :  { %v571_v45 = vpop.permute.xlu2 %570 }
 0x5e8   :  { %v573_v46 = vadd.f32 %v571_v45, %v515_v63  ;;  %v154_v63 = vadd.f32 %v1851_v27, %v153_v62 }
 0x5ea   :  { %1495 = vtanh.f32 %v573_v46  ;;  %172 = vst.msk [vmem:[#allocation2 + $0x18] sm:$0xff] %vm168_vm1, %v154_v63 }
 0x5f0   :  { %v1496_v47 = vpop.eup %1495 }
 0x5f1   :  { %577 = vrot.lane.b32.xlu1 %v1496_v47, %s1677_s0  ;;  %v649_v6 = vld [vmem:[#allocation2 + $0x18] sm:$0xff] }
 0x607   :  { %v636_v48 = vpop.permute.xlu0 %635 }
 0x608   :  { %v638_v50 = vadd.f32 %v636_v48, %v517_v3 }
 0x60a   :  { %1497 = vtanh.f32 %v638_v50 }
 0x610   :  { %v1498_v52 = vpop.eup %1497 }
 0x611   :  { %642 = vrot.lane.b32.xlu2 %v1498_v52, %s1677_s0 }
 0x663   :  { %v578_v54 = vpop.permute.xlu1 %577 }
 0x664   :  { %v580_v57 = vmul.f32 %v578_v54, %v575_v53 }
 0x666   :  { %v1937_v58 = vadd.f32 %v581_v55, %v580_v57 }
 0x668   :  { %653 = vrot.lane.b32.xlu0 %v1937_v58, %s1677_s0 }
 0x66b   :  { %v643_v49 = vpop.permute.xlu2 %642 }
 0x66c   :  { %v645_v60 = vmul.f32 %v643_v49, %v640_v44 }
 0x66e   :  { %v1942_v61 = vadd.f32 %v646_v59, %v645_v60 }
 0x670   :  { %718 = vrot.lane.b32.xlu1 %v1942_v61, %s1677_s0 }
 0x6da   :  { %v654_v51 = vpop.permute.xlu0 %653 }
 0x6db   :  { %1427 = vmatmul.msk.f32.vlgmr.msrb.gmra.mxu2 %vm102_vm0, %v654_v51 }
 0x6dc   :  { %937 = vmatpush.msrb.mxu2 %v1751_v2 }
 0x6de   :  { %938 = vmatpush.msrb.mxu2 %v1756_v5 }
 0x6e0   :  { %939 = vmatpush.msrb.mxu2 %v1762_v8 }
 0x6e2   :  { %v719_v56 = vpop.permute.xlu1 %718  ;;  %940 = vmatpush.msrb.mxu2 %v1770_v12 }
 0x6e3   :  { %1429 = vmatmul.msk.f32.vlgmr.msrb.gmra.mxu3 %vm102_vm0, %v719_v56 }
 0x6e4   :  { %1002 = vmatpush.msrb.mxu3 %v1768_v11 }
 0x6e6   :  { %1003 = vmatpush.msrb.mxu3 %v1780_v15 }
 0x6e8   :  { %1004 = vmatpush.msrb.mxu3 %v1785_v17 }
 0x6ea   :  { %1005 = vmatpush.msrb.mxu3 %v1789_v18 }
 0x75e   :  { %v674_v0 = vpop.f32.mrf.mxu2 }
 0x75f   :  { %v697_v1 = vadd.f32 %v674_v0, %v1857_v32  ;;  %v677_v7 = vadd.f32 %v674_v0, %v649_v6 }
 0x761   :  { %699 = vrot.lane.b32.xlu2 %v697_v1, %s1676_s1  ;;  %v1428_v9 = vmul.f32 -1.442695, %v677_v7 }
 0x763   :  { %1499 = vpow2.f32 %v1428_v9 }
 0x766   :  { %v739_v3 = vpop.f32.mrf.mxu3 }
 0x767   :  { %v762_v4 = vadd.f32 %v739_v3, %v1863_v38  ;;  %v742_v20 = vadd.f32 %v739_v3, %v651_v19 }
 0x769   :  { %764 = vrot.lane.b32.xlu0 %v762_v4, %s1676_s1  ;;  %v1500_v10 = vpop.eup %1499  ;;  %v1430_v22 = vmul.f32 -1.442695, %v742_v20 }
 0x76a   :  { %v681_v13 = vadd.f32 1.0, %v1500_v10 }
 0x76c   :  { %1501 = vrcp.f32 %v681_v13  ;;  %v693_v25 = vand.u32 2147483648, %v681_v13  ;;  %vm687_vm13 = vweird.f32 %v681_v13  ;;  %v691_v26 = vand.u32 2147483647, %v681_v13 }
 0x76d   :  { %1503 = vpow2.f32 %v1430_v22 }
 0x76e   :  { %v694_v30 = vor.u32 1.1754944e-38, %v693_v25  ;;  %vm692_vm15 = vcmp.eq.f32.partialorder %v691_v26, 8.507059e+37 }
 0x772   :  { %v1502_v14 = vpop.eup %1501 }
 0x773   :  { %v683_v16 = vmul.f32 %v1502_v14, %v681_v13  ;;  %vm688_vm12 = vweird.f32 %v1502_v14  ;;  %v1504_v28 = vpop.eup %1503 }
 0x774   :  { %vm689_vm14 = vmor %vm687_vm13, %vm688_vm12  ;;  %v746_v31 = vadd.f32 1.0, %v1504_v28 }
 0x775   :  { %v684_v21 = vsub.f32 1.0, %v683_v16 }
 0x776   :  { %1505 = vrcp.f32 %v746_v31  ;;  %v758_v42 = vand.u32 2147483648, %v746_v31  ;;  %vm752_vm3 = vweird.f32 %v746_v31  ;;  %v756_v43 = vand.u32 2147483647, %v746_v31 }
 0x777   :  { %v685_v23 = vmul.f32 %v1502_v14, %v684_v21 }
 0x778   :  { %v759_v46 = vor.u32 1.1754944e-38, %v758_v42  ;;  %vm757_vm5 = vcmp.eq.f32.partialorder %v756_v43, 8.507059e+37 }
 0x779   :  { %v686_v24 = vadd.f32 %v1502_v14, %v685_v23 }
 0x77b   :  { %v690_v29 = vsel %vm689_vm14, %v1502_v14, %v686_v24 }
 0x77c   :  { %v695_v33 = vsel %vm692_vm15, %v694_v30, %v690_v29  ;;  %v1506_v36 = vpop.eup %1505 }
 0x77d   :  { %v748_v37 = vmul.f32 %v1506_v36, %v746_v31  ;;  %vm753_vm2 = vweird.f32 %v1506_v36  ;;  %v709_v49 = vsub.f32 1.0, %v695_v33  ;;  %v715_v60 = vmul.f32 %v695_v33, %v1937_v58  ;;  %v156_v58 = vpop.f32.mrf.mxu0 }
 0x77e   :  { %vm754_vm4 = vmor %vm752_vm3, %vm753_vm2 }
 0x77f   :  { %v749_v39 = vsub.f32 1.0, %v748_v37 }
 0x781   :  { %v750_v40 = vmul.f32 %v1506_v36, %v749_v39 }
 0x783   :  { %v751_v41 = vadd.f32 %v1506_v36, %v750_v40 }
 0x785   :  { %v755_v45 = vsel %vm754_vm4, %v1506_v36, %v751_v41 }
 0x786   :  { %v760_v48 = vsel %vm757_vm5, %v759_v46, %v755_v45 }
 0x787   :  { %v774_v51 = vsub.f32 1.0, %v760_v48  ;;  %v780_v0 = vmul.f32 %v760_v48, %v1942_v61 }
 0x7bb   :  { %v700_v34 = vpop.permute.xlu2 %699 }
 0x7bc   :  { %v702_v35 = vmul.f32 %v700_v34, %v695_v33 }
 0x7be   :  { %704 = vrot.lane.b32.xlu1 %v702_v35, %s1676_s1 }
 0x7db   :  { %v765_v47 = vpop.permute.xlu0 %764 }
 0x7dc   :  { %v767_v50 = vmul.f32 %v765_v47, %v760_v48 }
 0x7de   :  { %769 = vrot.lane.b32.xlu2 %v767_v50, %s1676_s1 }
 0x830   :  { %v705_v52 = vpop.permute.xlu1 %704 }
 0x831   :  { %v707_v53 = vadd.f32 %v705_v52, %v649_v6  ;;  %v157_v6 = vadd.f32 %v1851_v27, %v156_v58  ;;  %v1559_v58 = vld [vmem:[#allocation4 + $0x18] sm:$0xff] }
 0x833   :  { %1507 = vtanh.f32 %v707_v53  ;;  %173 = vst.msk [vmem:[#allocation2 + $0x20] sm:$0xff] %vm168_vm1, %v157_v6  ;;  %v1560_v6 = vld [vmem:[#allocation4 + $0x10] sm:$0xff] }
 0x838   :  { %v770_v54 = vpop.permute.xlu2 %769 }
 0x839   :  { %v1508_v55 = vpop.eup %1507  ;;  %v772_v57 = vadd.f32 %v770_v54, %v651_v19 }
 0x83a   :  { %711 = vrot.lane.b32.xlu0 %v1508_v55, %s1677_s0 }
 0x83b   :  { %1509 = vtanh.f32 %v772_v57 }
 0x841   :  { %v1510_v44 = vpop.eup %1509 }
 0x842   :  { %776 = vrot.lane.b32.xlu1 %v1510_v44, %s1677_s0 }
 0x8ac   :  { %v712_v59 = vpop.permute.xlu0 %711 }
 0x8ad   :  { %v714_v62 = vmul.f32 %v712_v59, %v709_v49 }
 0x8af   :  { %v1967_v63 = vadd.f32 %v715_v60, %v714_v62 }
 0x8b1   :  { %787 = vrot.lane.b32.xlu2 %v1967_v63, %s1677_s0 }
 0x8b4   :  { %v777_v56 = vpop.permute.xlu1 %776 }
 0x8b5   :  { %v779_v1 = vmul.f32 %v777_v56, %v774_v51 }
 0x8b7   :  { %v1972_v3 = vadd.f32 %v780_v0, %v779_v1  ;;  %v159_v1 = vpop.f32.mrf.mxu0 }
 0x8b9   :  { %852 = vrot.lane.b32.xlu0 %v1972_v3, %s1677_s0 }
 0x90b   :  { %v788_v4 = vpop.permute.xlu2 %787 }
 0x90c   :  { %1431 = vmatmul.msk.f32.vlgmr.msra.gmra.mxu2 %vm102_vm0, %v788_v4  ;;  %v160_v4 = vadd.f32 %v1851_v27, %v159_v1  ;;  %v1565_v27 = vld [vmem:[#allocation9 + $0x8] sm:$0xff] }
 0x90d   :  { %1071 = vmatpush.msra.mxu2 %v1751_v2 }
 0x90e   :  { %174 = vst.msk [vmem:[#allocation2 + $0x28] sm:$0xff] %vm168_vm1, %v160_v4 }
 0x90f   :  { %1072 = vmatpush.msra.mxu2 %v1756_v5 }
 0x911   :  { %1073 = vmatpush.msra.mxu2 %v1762_v8 }
 0x913   :  { %1074 = vmatpush.msra.mxu2 %v1770_v12  ;;  %v783_v12 = vld [vmem:[#allocation2 + $0x20] sm:$0xff] }
 0x92b   :  { %v853_v61 = vpop.permute.xlu0 %852 }
 0x92c   :  { %1433 = vmatmul.msk.f32.vlgmr.msra.gmra.mxu3 %vm102_vm0, %v853_v61  ;;  %v1561_v61 = vld [vmem:[#allocation4 + $0x8] sm:$0xff] }
 0x92d   :  { %1136 = vmatpush.msra.mxu3 %v1768_v11  ;;  %v785_v11 = vld [vmem:[#allocation3 + $0x18] sm:$0xff] }
 0x92f   :  { %1137 = vmatpush.msra.mxu3 %v1780_v15 }
 0x931   :  { %1138 = vmatpush.msra.mxu3 %v1785_v17 }
 0x933   :  { %1139 = vmatpush.msra.mxu3 %v1789_v18 }
 0x98f   :  { %v808_v2 = vpop.f32.mrf.mxu2 }
 0x990   :  { %v831_v7 = vadd.f32 %v808_v2, %v1857_v32  ;;  %v811_v9 = vadd.f32 %v808_v2, %v783_v12  ;;  %v1562_v2 = vld [vmem:[#allocation4] sm:$0xff] }
 0x992   :  { %833 = vrot.lane.b32.xlu1 %v831_v7, %s1676_s1  ;;  %v1432_v10 = vmul.f32 -1.442695, %v811_v9  ;;  %v1563_v7 = vld [vmem:[#allocation9 + $0x18] sm:$0xff] }
 0x994   :  { %1511 = vpow2.f32 %v1432_v10 }
 0x99a   :  { %v1512_v17 = vpop.eup %1511 }
 0x99b   :  { %v815_v18 = vadd.f32 1.0, %v1512_v17 }
 0x99d   :  { %v827_v28 = vand.u32 2147483648, %v815_v18  ;;  %vm821_vm7 = vweird.f32 %v815_v18  ;;  %v825_v29 = vand.u32 2147483647, %v815_v18 }
 0x99f   :  { %v828_v33 = vor.u32 1.1754944e-38, %v827_v28  ;;  %vm826_vm9 = vcmp.eq.f32.partialorder %v825_v29, 8.507059e+37 }
 0x9af   :  { %v873_v5 = vpop.f32.mrf.mxu3 }
 0x9b0   :  { %v896_v8 = vadd.f32 %v873_v5, %v1863_v38  ;;  %v876_v15 = vadd.f32 %v873_v5, %v785_v11  ;;  %v1564_v5 = vld [vmem:[#allocation9 + $0x10] sm:$0xff] }
 0x9b2   :  { %898 = vrot.lane.b32.xlu2 %v896_v8, %s1676_s1  ;;  %v1434_v13 = vmul.f32 -1.442695, %v876_v15  ;;  %v1566_v8 = vld [vmem:[#allocation9] sm:$0xff]  ;;  %v917_v15 = vld [vmem:[#allocation2 + $0x28] sm:$0xff] }
 0x9b4   :  { %1513 = vpow2.f32 %v1434_v13 }
 0x9b5   :  { %1515 = vrcp.f32 %v815_v18 }
 0x9ba   :  { %v1514_v14 = vpop.eup %1513 }
 0x9bb   :  { %v880_v16 = vadd.f32 1.0, %v1514_v14  ;;  %v1516_v19 = vpop.eup %1515 }
 0x9bc   :  { %v817_v20 = vmul.f32 %v1516_v19, %v815_v18  ;;  %vm822_vm6 = vweird.f32 %v1516_v19  ;;  %v919_v18 = vld [vmem:[#allocation3 + $0x10] sm:$0xff] }
 0x9bd   :  { %1517 = vrcp.f32 %v880_v16  ;;  %vm823_vm8 = vmor %vm821_vm7, %vm822_vm6  ;;  %v892_v39 = vand.u32 2147483648, %v880_v16  ;;  %vm886_vm11 = vweird.f32 %v880_v16  ;;  %v890_v40 = vand.u32 2147483647, %v880_v16 }
 0x9be   :  { %v818_v21 = vsub.f32 1.0, %v817_v20 }
 0x9bf   :  { %v893_v42 = vor.u32 1.1754944e-38, %v892_v39  ;;  %vm891_vm13 = vcmp.eq.f32.partialorder %v890_v40, 8.507059e+37 }
 0x9c0   :  { %v819_v23 = vmul.f32 %v1516_v19, %v818_v21 }
 0x9c2   :  { %v820_v25 = vadd.f32 %v1516_v19, %v819_v23 }
 0x9c3   :  { %v1518_v22 = vpop.eup %1517 }
 0x9c4   :  { %v882_v24 = vmul.f32 %v1518_v22, %v880_v16  ;;  %v824_v30 = vsel %vm823_vm8, %v1516_v19, %v820_v25  ;;  %vm887_vm10 = vweird.f32 %v1518_v22 }
 0x9c5   :  { %v829_v35 = vsel %vm826_vm9, %v828_v33, %v824_v30  ;;  %vm888_vm12 = vmor %vm886_vm11, %vm887_vm10 }
 0x9c6   :  { %v883_v26 = vsub.f32 1.0, %v882_v24  ;;  %v843_v55 = vsub.f32 1.0, %v829_v35  ;;  %v849_v44 = vmul.f32 %v829_v35, %v1967_v63 }
 0x9c8   :  { %v884_v31 = vmul.f32 %v1518_v22, %v883_v26 }
 0x9ca   :  { %v885_v37 = vadd.f32 %v1518_v22, %v884_v31 }
 0x9cc   :  { %v889_v41 = vsel %vm888_vm12, %v1518_v22, %v885_v37 }
 0x9cd   :  { %v894_v43 = vsel %vm891_vm13, %v893_v42, %v889_v41 }
 0x9ce   :  { %v908_v60 = vsub.f32 1.0, %v894_v43  ;;  %v914_v51 = vmul.f32 %v894_v43, %v1972_v3 }
 0xa04   :  { %v834_v34 = vpop.permute.xlu1 %833 }
 0xa05   :  { %v836_v36 = vmul.f32 %v834_v34, %v829_v35 }
 0xa07   :  { %838 = vrot.lane.b32.xlu0 %v836_v36, %s1676_s1 }
 0xa0c   :  { %v899_v45 = vpop.permute.xlu2 %898 }
 0xa0d   :  { %v901_v46 = vmul.f32 %v899_v45, %v894_v43 }
 0xa0f   :  { %903 = vrot.lane.b32.xlu1 %v901_v46, %s1676_s1 }
 0xa79   :  { %v839_v47 = vpop.permute.xlu0 %838 }
 0xa7a   :  { %v841_v48 = vadd.f32 %v839_v47, %v783_v12 }
 0xa7c   :  { %1519 = vtanh.f32 %v841_v48 }
 0xa81   :  { %v904_v50 = vpop.permute.xlu1 %903 }
 0xa82   :  { %v1520_v52 = vpop.eup %1519  ;;  %v906_v53 = vadd.f32 %v904_v50, %v785_v11 }
 0xa83   :  { %845 = vrot.lane.b32.xlu2 %v1520_v52, %s1677_s0 }
 0xa84   :  { %1521 = vtanh.f32 %v906_v53 }
 0xa8a   :  { %v1522_v54 = vpop.eup %1521 }
 0xa8b   :  { %910 = vrot.lane.b32.xlu0 %v1522_v54, %s1677_s0 }
 0xadd   :  { %v846_v57 = vpop.permute.xlu2 %845 }
 0xade   :  { %v848_v49 = vmul.f32 %v846_v57, %v843_v55 }
 0xae0   :  { %v1997_v59 = vadd.f32 %v849_v44, %v848_v49 }
 0xae2   :  { %921 = vrot.lane.b32.xlu1 %v1997_v59, %s1677_s0 }
 0xafd   :  { %v911_v62 = vpop.permute.xlu0 %910 }
 0xafe   :  { %v913_v56 = vmul.f32 %v911_v62, %v908_v60 }
 0xb00   :  { %v2002_v0 = vadd.f32 %v914_v51, %v913_v56 }
 0xb02   :  { %986 = vrot.lane.b32.xlu2 %v2002_v0, %s1677_s0 }
 0xb54   :  { %v922_v63 = vpop.permute.xlu1 %921 }
 0xb55   :  { %1435 = vmatmul.msk.f32.vlgmr.msrb.gmra.mxu2 %vm102_vm0, %v922_v63 }
 0xb56   :  { %1204 = vmatpush.msrb.mxu2 %v1559_v58 }
 0xb58   :  { %1205 = vmatpush.msrb.mxu2 %v1560_v6 }
 0xb5a   :  { %1206 = vmatpush.msrb.mxu2 %v1561_v61 }
 0xb5c   :  { %v987_v3 = vpop.permute.xlu2 %986  ;;  %1207 = vmatpush.msrb.mxu2 %v1562_v2 }
 0xb5d   :  { %1437 = vmatmul.msk.f32.vlgmr.msrb.gmra.mxu3 %vm102_vm0, %v987_v3  ;;  %v162_v3 = vpop.f32.mrf.mxu0 }
 0xb5e   :  { %1269 = vmatpush.msrb.mxu3 %v1563_v7 }
 0xb60   :  { %1270 = vmatpush.msrb.mxu3 %v1564_v5 }
 0xb62   :  { %1271 = vmatpush.msrb.mxu3 %v1565_v27 }
 0xb64   :  { %1272 = vmatpush.msrb.mxu3 %v1566_v8 }
 0xbd8   :  { %v942_v12 = vpop.f32.mrf.mxu2 }
 0xbd9   :  { %v965_v9 = vadd.f32 %v942_v12, %v1857_v32  ;;  %v945_v13 = vadd.f32 %v942_v12, %v917_v15 }
 0xbdb   :  { %967 = vrot.lane.b32.xlu0 %v965_v9, %s1676_s1  ;;  %v1436_v17 = vmul.f32 -1.442695, %v945_v13 }
 0xbdd   :  { %1523 = vpow2.f32 %v1436_v17 }
 0xbe0   :  { %v1007_v10 = vpop.f32.mrf.mxu3 }
 0xbe1   :  { %v1030_v11 = vadd.f32 %v1007_v10, %v1863_v38  ;;  %v1010_v14 = vadd.f32 %v1007_v10, %v919_v18 }
 0xbe3   :  { %1032 = vrot.lane.b32.xlu1 %v1030_v11, %s1676_s1  ;;  %v1438_v16 = vmul.f32 -1.442695, %v1010_v14  ;;  %v1524_v19 = vpop.eup %1523  ;;  %v1053_v14 = vld [vmem:[#allocation3 + $0x8] sm:$0xff] }
 0xbe4   :  { %v949_v20 = vadd.f32 1.0, %v1524_v19 }
 0xbe5   :  { %1525 = vpow2.f32 %v1438_v16 }
 0xbe6   :  { %1527 = vrcp.f32 %v949_v20  ;;  %v961_v33 = vand.u32 2147483648, %v949_v20  ;;  %vm955_vm15 = vweird.f32 %v949_v20  ;;  %v959_v34 = vand.u32 2147483647, %v949_v20 }
 0xbe8   :  { %v962_v37 = vor.u32 1.1754944e-38, %v961_v33  ;;  %vm960_vm3 = vcmp.eq.f32.partialorder %v959_v34, 8.507059e+37 }
 0xbeb   :  { %v1526_v21 = vpop.eup %1525 }
 0xbec   :  { %v1014_v22 = vadd.f32 1.0, %v1526_v21  ;;  %v1528_v23 = vpop.eup %1527 }
 0xbed   :  { %v951_v24 = vmul.f32 %v1528_v23, %v949_v20  ;;  %vm956_vm14 = vweird.f32 %v1528_v23 }
 0xbee   :  { %1529 = vrcp.f32 %v1014_v22  ;;  %vm957_vm2 = vmor %vm955_vm15, %vm956_vm14  ;;  %v1026_v43 = vand.u32 2147483648, %v1014_v22  ;;  %vm1020_vm5 = vweird.f32 %v1014_v22  ;;  %v1024_v45 = vand.u32 2147483647, %v1014_v22 }
 0xbef   :  { %v952_v25 = vsub.f32 1.0, %v951_v24 }
 0xbf0   :  { %v1027_v47 = vor.u32 1.1754944e-38, %v1026_v43  ;;  %vm1025_vm7 = vcmp.eq.f32.partialorder %v1024_v45, 8.507059e+37 }
 0xbf1   :  { %v953_v28 = vmul.f32 %v1528_v23, %v952_v25 }
 0xbf3   :  { %v954_v30 = vadd.f32 %v1528_v23, %v953_v28 }
 0xbf4   :  { %v1530_v26 = vpop.eup %1529 }
 0xbf5   :  { %v1016_v29 = vmul.f32 %v1530_v26, %v1014_v22  ;;  %v958_v35 = vsel %vm957_vm2, %v1528_v23, %v954_v30  ;;  %vm1021_vm4 = vweird.f32 %v1530_v26 }
 0xbf6   :  { %v963_v40 = vsel %vm960_vm3, %v962_v37, %v958_v35  ;;  %vm1022_vm6 = vmor %vm1020_vm5, %vm1021_vm4 }
 0xbf7   :  { %v1017_v31 = vsub.f32 1.0, %v1016_v29  ;;  %v977_v60 = vsub.f32 1.0, %v963_v40  ;;  %v983_v51 = vmul.f32 %v963_v40, %v1997_v59  ;;  %v2031_v59 = vld [vmem:[%s2106_s3] ss:$0 sm:$0xff] }
 0xbf8   :  { %v163_v2 = vadd.f32 %v2031_v59, %v162_v3 }
 0xbf9   :  { %v1018_v36 = vmul.f32 %v1530_v26, %v1017_v31 }
 0xbfa   :  { %175 = vst.msk [vmem:[#allocation2 + $0x30] sm:$0xff] %vm168_vm1, %v163_v2 }
 0xbfb   :  { %v1019_v42 = vadd.f32 %v1530_v26, %v1018_v36 }
 0xbfd   :  { %v1023_v46 = vsel %vm1022_vm6, %v1530_v26, %v1019_v42 }
 0xbfe   :  { %v1028_v50 = vsel %vm1025_vm7, %v1027_v47, %v1023_v46 }
 0xbff   :  { %v1042_v4 = vsub.f32 1.0, %v1028_v50  ;;  %v1048_v58 = vmul.f32 %v1028_v50, %v2002_v0 }
 0xc01   :  { %v1051_v9 = vld [vmem:[#allocation2 + $0x30] sm:$0xff] }
 0xc4d   :  { %v968_v39 = vpop.permute.xlu0 %967 }
 0xc4e   :  { %v970_v41 = vmul.f32 %v968_v39, %v963_v40 }
 0xc50   :  { %972 = vrot.lane.b32.xlu2 %v970_v41, %s1676_s1 }
 0xc55   :  { %v1033_v48 = vpop.permute.xlu1 %1032 }
 0xc56   :  { %v1035_v52 = vmul.f32 %v1033_v48, %v1028_v50 }
 0xc58   :  { %1037 = vrot.lane.b32.xlu0 %v1035_v52, %s1676_s1 }
 0xcaa   :  { %v973_v53 = vpop.permute.xlu2 %972 }
 0xcab   :  { %v975_v54 = vadd.f32 %v973_v53, %v917_v15 }
 0xcad   :  { %1531 = vtanh.f32 %v975_v54 }
 0xcb3   :  { %v1532_v55 = vpop.eup %1531 }
 0xcb4   :  { %979 = vrot.lane.b32.xlu1 %v1532_v55, %s1677_s0 }
 0xcca   :  { %v1038_v57 = vpop.permute.xlu0 %1037 }
 0xccb   :  { %v1040_v44 = vadd.f32 %v1038_v57, %v919_v18 }
 0xccd   :  { %1533 = vtanh.f32 %v1040_v44 }
 0xcd3   :  { %v1534_v49 = vpop.eup %1533 }
 0xcd4   :  { %1044 = vrot.lane.b32.xlu2 %v1534_v49, %s1677_s0 }
 0xd26   :  { %v980_v62 = vpop.permute.xlu1 %979 }
 0xd27   :  { %v982_v56 = vmul.f32 %v980_v62, %v977_v60 }
 0xd29   :  { %v2019_v1 = vadd.f32 %v983_v51, %v982_v56 }
 0xd2b   :  { %1055 = vrot.lane.b32.xlu0 %v2019_v1, %s1677_s0 }
 0xd2e   :  { %v1045_v63 = vpop.permute.xlu2 %1044 }
 0xd2f   :  { %v1047_v6 = vmul.f32 %v1045_v63, %v1042_v4 }
 0xd31   :  { %v2024_v61 = vadd.f32 %v1048_v58, %v1047_v6 }
 0xd33   :  { %1120 = vrot.lane.b32.xlu1 %v2024_v61, %s1677_s0 }
 0xd9d   :  { %v1056_v7 = vpop.permute.xlu0 %1055 }
 0xd9e   :  { %1439 = vmatmul.msk.f32.vlgmr.msra.gmra.mxu2 %vm102_vm0, %v1056_v7 }
 0xda5   :  { %v1121_v0 = vpop.permute.xlu1 %1120 }
 0xda6   :  { %1441 = vmatmul.msk.f32.vlgmr.msra.gmra.mxu3 %vm102_vm0, %v1121_v0 }
 0xe21   :  { %v1076_v5 = vpop.f32.mrf.mxu2 }
 0xe22   :  { %v1099_v27 = vadd.f32 %v1076_v5, %v1857_v32  ;;  %v1079_v10 = vadd.f32 %v1076_v5, %v1051_v9 }
 0xe24   :  { %1101 = vrot.lane.b32.xlu2 %v1099_v27, %s1676_s1  ;;  %v1440_v11 = vmul.f32 -1.442695, %v1079_v10 }
 0xe26   :  { %1535 = vpow2.f32 %v1440_v11 }
 0xe29   :  { %v1141_v8 = vpop.f32.mrf.mxu3 }
 0xe2a   :  { %v1164_v12 = vadd.f32 %v1141_v8, %v1863_v38  ;;  %v1144_v16 = vadd.f32 %v1141_v8, %v1053_v14 }
 0xe2c   :  { %1166 = vrot.lane.b32.xlu0 %v1164_v12, %s1676_s1  ;;  %v1536_v15 = vpop.eup %1535  ;;  %v1442_v20 = vmul.f32 -1.442695, %v1144_v16 }
 0xe2d   :  { %v1083_v13 = vadd.f32 1.0, %v1536_v15 }
 0xe2f   :  { %1537 = vrcp.f32 %v1083_v13  ;;  %v1095_v23 = vand.u32 2147483648, %v1083_v13  ;;  %vm1089_vm9 = vweird.f32 %v1083_v13  ;;  %v1093_v24 = vand.u32 2147483647, %v1083_v13 }
 0xe30   :  { %1539 = vpow2.f32 %v1442_v20 }
 0xe31   :  { %v1096_v28 = vor.u32 1.1754944e-38, %v1095_v23  ;;  %vm1094_vm11 = vcmp.eq.f32.partialorder %v1093_v24, 8.507059e+37 }
 0xe35   :  { %v1538_v17 = vpop.eup %1537 }
 0xe36   :  { %v1085_v18 = vmul.f32 %v1538_v17, %v1083_v13  ;;  %vm1090_vm8 = vweird.f32 %v1538_v17  ;;  %v1540_v25 = vpop.eup %1539 }
 0xe37   :  { %vm1091_vm10 = vmor %vm1089_vm9, %vm1090_vm8  ;;  %v1148_v29 = vadd.f32 1.0, %v1540_v25 }
 0xe38   :  { %v1086_v19 = vsub.f32 1.0, %v1085_v18 }
 0xe39   :  { %1541 = vrcp.f32 %v1148_v29  ;;  %v1160_v40 = vand.u32 2147483648, %v1148_v29  ;;  %vm1154_vm13 = vweird.f32 %v1148_v29  ;;  %v1158_v41 = vand.u32 2147483647, %v1148_v29 }
 0xe3a   :  { %v1087_v21 = vmul.f32 %v1538_v17, %v1086_v19 }
 0xe3b   :  { %v1161_v43 = vor.u32 1.1754944e-38, %v1160_v40  ;;  %vm1159_vm15 = vcmp.eq.f32.partialorder %v1158_v41, 8.507059e+37 }
 0xe3c   :  { %v1088_v22 = vadd.f32 %v1538_v17, %v1087_v21 }
 0xe3e   :  { %v1092_v26 = vsel %vm1091_vm10, %v1538_v17, %v1088_v22 }
 0xe3f   :  { %v1097_v30 = vsel %vm1094_vm11, %v1096_v28, %v1092_v26  ;;  %v1542_v34 = vpop.eup %1541 }
 0xe40   :  { %v1150_v35 = vmul.f32 %v1542_v34, %v1148_v29  ;;  %vm1155_vm12 = vweird.f32 %v1542_v34  ;;  %v1111_v57 = vsub.f32 1.0, %v1097_v30  ;;  %v1117_v49 = vmul.f32 %v1097_v30, %v2019_v1  ;;  %v165_v1 = vpop.f32.mrf.mxu0 }
 0xe41   :  { %vm1156_vm14 = vmor %vm1154_vm13, %vm1155_vm12  ;;  %v166_v3 = vadd.f32 %v2031_v59, %v165_v1 }
 0xe42   :  { %v1151_v36 = vsub.f32 1.0, %v1150_v35 }
 0xe43   :  { %176 = vst.msk [vmem:[#allocation2 + $0x38] sm:$0xff] %vm168_vm1, %v166_v3  ;;  %v1325_v3 = vld [vmem:[%s2112_s9 + $0x30] sm:$0xff] }
 0xe44   :  { %v1152_v37 = vmul.f32 %v1542_v34, %v1151_v36 }
 0xe46   :  { %v1153_v39 = vadd.f32 %v1542_v34, %v1152_v37 }
 0xe48   :  { %v1157_v42 = vsel %vm1156_vm14, %v1542_v34, %v1153_v39 }
 0xe49   :  { %v1162_v46 = vsel %vm1159_vm15, %v1161_v43, %v1157_v42 }
 0xe4a   :  { %v1176_v51 = vsub.f32 1.0, %v1162_v46  ;;  %v1182_v4 = vmul.f32 %v1162_v46, %v2024_v61  ;;  %v1185_v27 = vld [vmem:[#allocation2 + $0x38] sm:$0xff] }
 0xe7e   :  { %v1102_v31 = vpop.permute.xlu2 %1101 }
 0xe7f   :  { %v1104_v33 = vmul.f32 %v1102_v31, %v1097_v30 }
 0xe81   :  { %1106 = vrot.lane.b32.xlu1 %v1104_v33, %s1676_s1 }
 0xe9e   :  { %v1167_v45 = vpop.permute.xlu0 %1166 }
 0xe9f   :  { %v1169_v47 = vmul.f32 %v1167_v45, %v1162_v46 }
 0xea1   :  { %1171 = vrot.lane.b32.xlu2 %v1169_v47, %s1676_s1 }
 0xef3   :  { %v1107_v48 = vpop.permute.xlu1 %1106 }
 0xef4   :  { %v1109_v50 = vadd.f32 %v1107_v48, %v1051_v9  ;;  %v1186_v9 = vld [vmem:[#allocation3] sm:$0xff] }
 0xef6   :  { %1543 = vtanh.f32 %v1109_v50 }
 0xefb   :  { %v1172_v52 = vpop.permute.xlu2 %1171 }
 0xefc   :  { %v1544_v53 = vpop.eup %1543  ;;  %v1174_v54 = vadd.f32 %v1172_v52, %v1053_v14 }
 0xefd   :  { %1113 = vrot.lane.b32.xlu0 %v1544_v53, %s1677_s0 }
 0xefe   :  { %1545 = vtanh.f32 %v1174_v54 }
 0xf04   :  { %v1546_v55 = vpop.eup %1545 }
 0xf05   :  { %1178 = vrot.lane.b32.xlu1 %v1546_v55, %s1677_s0 }
 0xf6f   :  { %v1114_v44 = vpop.permute.xlu0 %1113 }
 0xf70   :  { %v1116_v60 = vmul.f32 %v1114_v44, %v1111_v57  ;;  %v1326_v57 = vld [vmem:[%s2112_s9 + $0x38] sm:$0xff] }
 0xf71   :  { %v1322_v44 = vld [vmem:[%s2112_s9 + $0x18] sm:$0xff]  ;;  %1344 = vmatpush.msrb.mxu0 %v1326_v57 }
 0xf72   :  { %v2046_v62 = vadd.f32 %v1117_v49, %v1116_v60  ;;  %v1321_v49 = vld [vmem:[%s2112_s9 + $0x10] sm:$0xff]  ;;  %1369 = vmatpush.msrb.mxu1 %v1322_v44  ;;  %v1320_v60 = vld [vmem:[%s2112_s9 + $0x8] sm:$0xff] }
 0xf73   :  { %1345 = vmatpush.msrb.mxu0 %v1325_v3 }
 0xf74   :  { %1188 = vrot.lane.b32.xlu2 %v2046_v62, %s1677_s0  ;;  %1370 = vmatpush.msrb.mxu1 %v1321_v49 }
 0xf76   :  { %1371 = vmatpush.msrb.mxu1 %v1320_v60 }
 0xf77   :  { %v1179_v56 = vpop.permute.xlu1 %1178 }
 0xf78   :  { %v1181_v63 = vmul.f32 %v1179_v56, %v1176_v51 }
 0xf7a   :  { %v2051_v58 = vadd.f32 %v1182_v4, %v1181_v63 }
 0xf7c   :  { %1253 = vrot.lane.b32.xlu0 %v2051_v58, %s1677_s0 }
 0xfce   :  { %v1189_v6 = vpop.permute.xlu2 %1188 }
 0xfcf   :  { %1443 = vmatmul.msk.f32.vlgmr.msrb.gmra.mxu2 %vm102_vm0, %v1189_v6 }
 0xfee   :  { %v1254_v2 = vpop.permute.xlu0 %1253 }
 0xfef   :  { %1445 = vmatmul.msk.f32.vlgmr.msrb.gmra.mxu3 %vm102_vm0, %v1254_v2  ;;  %v1324_v2 = vld [vmem:[%s2112_s9 + $0x28] sm:$0xff] }
 0xff0   :  { %1346 = vmatpush.msrb.mxu0 %v1324_v2 }
0x1052   :  { %v1209_v7 = vpop.f32.mrf.mxu2 }
0x1053   :  { %v1232_v61 = vadd.f32 %v1209_v7, %v1857_v32  ;;  %v1212_v8 = vadd.f32 %v1209_v7, %v1185_v27  ;;  %v1323_v7 = vld [vmem:[%s2112_s9 + $0x20] sm:$0xff] }
0x1054   :  { %1347 = vmatpush.msrb.mxu0 %v1323_v7 }
0x1055   :  { %1234 = vrot.lane.b32.xlu1 %v1232_v61, %s1676_s1  ;;  %v1444_v12 = vmul.f32 -1.442695, %v1212_v8 }
0x1057   :  { %1547 = vpow2.f32 %v1444_v12 }
0x105d   :  { %v1548_v11 = vpop.eup %1547 }
0x105e   :  { %v1216_v15 = vadd.f32 1.0, %v1548_v11 }
0x1060   :  { %v1228_v22 = vand.u32 2147483648, %v1216_v15  ;;  %vm1222_vm2 = vweird.f32 %v1216_v15  ;;  %v1226_v23 = vand.u32 2147483647, %v1216_v15 }
0x1062   :  { %v1229_v26 = vor.u32 1.1754944e-38, %v1228_v22  ;;  %vm1227_vm4 = vcmp.eq.f32.partialorder %v1226_v23, 8.507059e+37 }
0x1072   :  { %v1274_v0 = vpop.f32.mrf.mxu3 }
0x1073   :  { %v1297_v5 = vadd.f32 %v1274_v0, %v1863_v38  ;;  %v1277_v59 = vadd.f32 %v1274_v0, %v1186_v9  ;;  %v1462_v0 = vld [vmem:[%s2113_s10] ss:$0 sm:$0xff] }
0x1075   :  { %1299 = vrot.lane.b32.xlu2 %v1297_v5, %s1676_s1  ;;  %v1446_v10 = vmul.f32 -1.442695, %v1277_v59 }
0x1077   :  { %1549 = vpow2.f32 %v1446_v10 }
0x1078   :  { %1551 = vrcp.f32 %v1216_v15 }
0x107d   :  { %v1550_v13 = vpop.eup %1549 }
0x107e   :  { %v1281_v32 = vadd.f32 1.0, %v1550_v13  ;;  %v1552_v17 = vpop.eup %1551 }
0x107f   :  { %v1218_v18 = vmul.f32 %v1552_v17, %v1216_v15  ;;  %vm1223_vm1 = vweird.f32 %v1552_v17 }
0x1080   :  { %1553 = vrcp.f32 %v1281_v32  ;;  %vm1224_vm3 = vmor %vm1222_vm2, %vm1223_vm1  ;;  %v1293_v33 = vand.u32 2147483648, %v1281_v32  ;;  %vm1287_vm6 = vweird.f32 %v1281_v32  ;;  %v1291_v34 = vand.u32 2147483647, %v1281_v32 }
0x1081   :  { %v1219_v14 = vsub.f32 1.0, %v1218_v18 }
0x1082   :  { %v1294_v36 = vor.u32 1.1754944e-38, %v1293_v33  ;;  %vm1292_vm8 = vcmp.eq.f32.partialorder %v1291_v34, 8.507059e+37 }
0x1083   :  { %v1220_v16 = vmul.f32 %v1552_v17, %v1219_v14 }
0x1085   :  { %v1221_v20 = vadd.f32 %v1552_v17, %v1220_v16 }
0x1086   :  { %v1554_v38 = vpop.eup %1553 }
0x1087   :  { %v1283_v19 = vmul.f32 %v1554_v38, %v1281_v32  ;;  %v1225_v24 = vsel %vm1224_vm3, %v1552_v17, %v1221_v20  ;;  %vm1288_vm5 = vweird.f32 %v1554_v38 }
0x1088   :  { %v1230_v29 = vsel %vm1227_vm4, %v1229_v26, %v1225_v24  ;;  %vm1289_vm7 = vmor %vm1287_vm6, %vm1288_vm5 }
0x1089   :  { %v1284_v21 = vsub.f32 1.0, %v1283_v19  ;;  %v1244_v48 = vsub.f32 1.0, %v1230_v29  ;;  %v1250_v52 = vmul.f32 %v1230_v29, %v2046_v62  ;;  %v1319_v62 = vld [vmem:[%s2112_s9] sm:$0xff]  ;;  %s1390_s9 = sshll.u32 %s2114_s11, 4  ;;  %s1391_s9 = int_to_ptr.hbm [resolvable:$true] %s1390_s9 }
0x108a   :  { %1372 = vmatpush.msrb.mxu1 %v1319_v62 }
0x108b   :  { %v1285_v25 = vmul.f32 %v1554_v38, %v1284_v21 }
0x108d   :  { %v1286_v31 = vadd.f32 %v1554_v38, %v1285_v25 }
0x108f   :  { %v1290_v35 = vsel %vm1289_vm7, %v1554_v38, %v1286_v31 }
0x1090   :  { %v1295_v37 = vsel %vm1292_vm8, %v1294_v36, %v1290_v35 }
0x1091   :  { %v1309_v51 = vsub.f32 1.0, %v1295_v37  ;;  %v1315_v4 = vmul.f32 %v1295_v37, %v2051_v58 }
0x10c7   :  { %v1235_v28 = vpop.permute.xlu1 %1234 }
0x10c8   :  { %v1237_v30 = vmul.f32 %v1235_v28, %v1230_v29 }
0x10ca   :  { %1239 = vrot.lane.b32.xlu0 %v1237_v30, %s1676_s1 }
0x10cf   :  { %v1300_v39 = vpop.permute.xlu2 %1299 }
0x10d0   :  { %v1302_v40 = vmul.f32 %v1300_v39, %v1295_v37 }
0x10d2   :  { %1304 = vrot.lane.b32.xlu1 %v1302_v40, %s1676_s1 }
0x113c   :  { %v1240_v41 = vpop.permute.xlu0 %1239 }
0x113d   :  { %v1242_v42 = vadd.f32 %v1240_v41, %v1185_v27 }
0x113f   :  { %1555 = vtanh.f32 %v1242_v42 }
0x1144   :  { %v1305_v43 = vpop.permute.xlu1 %1304 }
0x1145   :  { %v1556_v45 = vpop.eup %1555  ;;  %v1307_v46 = vadd.f32 %v1305_v43, %v1186_v9 }
0x1146   :  { %1246 = vrot.lane.b32.xlu2 %v1556_v45, %s1677_s0 }
0x1147   :  { %1557 = vtanh.f32 %v1307_v46 }
0x114d   :  { %v1558_v47 = vpop.eup %1557 }
0x114e   :  { %1311 = vrot.lane.b32.xlu0 %v1558_v47, %s1677_s0 }
0x11a0   :  { %v1247_v50 = vpop.permute.xlu2 %1246 }
0x11a1   :  { %v1249_v53 = vmul.f32 %v1247_v50, %v1244_v48 }
0x11a3   :  { %v1251_v54 = vadd.f32 %v1250_v52, %v1249_v53 }
0x11a5   :  { %v1317_v55 = vmax.f32 %v1251_v54, 0.0 }
0x11a7   :  { %1353 = vrot.lane.b32.xlu2 %v1317_v55, %s1677_s0 }
0x11c0   :  { %v1312_v56 = vpop.permute.xlu0 %1311 }
0x11c1   :  { %v1314_v63 = vmul.f32 %v1312_v56, %v1309_v51 }
0x11c3   :  { %v1316_v6 = vadd.f32 %v1315_v4, %v1314_v63 }
0x11c5   :  { %v1318_v1 = vmax.f32 %v1316_v6, 0.0 }
0x11c7   :  { %1328 = vrot.lane.b32.xlu1 %v1318_v1, %s1677_s0 }
0x1201   :  { %v1354_v58 = vpop.permute.xlu2 %1353 }
0x1202   :  { %1448 = vmatmul.msk.f32.vlgmr.msrb.gmra.mxu1 %vm102_vm0, %v1354_v58 }
0x1239   :  { %v1329_v61 = vpop.permute.xlu1 %1328 }
0x123a   :  { %1447 = vmatmul.msk.f32.vlgmr.msrb.gmra.mxu0 %vm102_vm0, %v1329_v61 }
0x127f   :  { %v1374_v5 = vpop.f32.mrf.mxu1 }
0x12b7   :  { %v1349_v27 = vpop.f32.mrf.mxu0 }
0x12b8   :  { %v1375_v8 = vadd.f32 %v1374_v5, %v1349_v27 }
0x12ba   :  { %v1381_v12 = vadd.f32 %v1462_v0, %v1375_v8 }
0x12bc   :  { %1382 = vst [vmem:[#allocation10] sm:$0xff] %v1381_v12 }
0x12bd   :  { %1393 = dma.vmem_to_hbm [thread:$0]  %s1389_s6, 128, %s1391_s9, [#allocation6]  }
0x12be   :  { %1668 = dma.done.wait [#allocation6], 128  }
0x12bf   :  { %1669 = vsyncadd [#allocation6], 4294967168 }
0x12c0   :  { %1398 = vsyncpa [#allocation5], 1 }
0x12c1   :  { %1399 = vsyncpa [#allocation8], 1 }
0x12c2   :  { %1400 = vsyncpa [#allocation6], 1 }

</bundles_post_ra>
